<compile_context>
chip_gen: v5e
topology: v5e:2x2
jax: 0.10.0
libtpu: 0.0.40
codegen_flags: <defaults>
</compile_context>

<pallas_src>
import functools
import math

import jax
import jax.numpy as jnp
from jax.experimental import pallas as pl
from jax.experimental.pallas import tpu as pltpu


def _round_up(x, m):
    return (x + m - 1) // m * m


def text_mlp_kernel(x_ref, w1_ref, b1_ref, w2_ref, b2_ref, gamma_ref, beta_ref,
                    out_ref, *, inv_n, eps):
    # x_ref: (tm, Din)   w1_ref: (Din, Hp)   w2_ref: (Hp, Dp)   out_ref: (tm, Dp)
    # Cast to the weight dtype (bf16 path) so the MXU runs at full rate; f32 accum.
    x = x_ref[...].astype(w1_ref.dtype)

    # Linear1 + ReLU  (padded hidden lanes of W1/b1 are 0 -> h padded lanes stay 0)
    h = jnp.dot(x, w1_ref[...], preferred_element_type=jnp.float32) + b1_ref[...]
    h = jnp.maximum(h, 0.0)

    # Linear2 + ReLU  (padded output lanes of W2/b2 are 0 -> y padded lanes stay 0)
    h = h.astype(w2_ref.dtype)
    y = jnp.dot(h, w2_ref[...], preferred_element_type=jnp.float32) + b2_ref[...]
    y = jnp.maximum(y, 0.0)                      # (tm, Dp), padded lanes == 0

    # LayerNorm over the real d_out lanes, single pass:
    #   mean = sum(y)/n,  var = sum(y*y)/n - mean^2
    # Sums over the full padded width are already the sums over the real lanes
    # because padded lanes of y are exactly 0 (ReLU after zero-padded W2/b2).
    mean = jnp.sum(y, axis=-1, keepdims=True) * inv_n
    var = jnp.sum(y * y, axis=-1, keepdims=True) * inv_n - mean * mean
    normed = (y - mean) * jax.lax.rsqrt(var + eps)
    # gamma/beta are zero-padded, so padded output lanes land at exactly 0.
    out_ref[...] = (normed * gamma_ref[...] + beta_ref[...]).astype(out_ref.dtype)


def prepare_params(w1, b1, w2, b2, gamma, beta, *, use_bf16=True):
    """One-time (model-init) padding + dtype prep of the static parameters.

    Hoisted out of the per-call wrapper per the perf review: the pad/convert ops
    over W1/W2 run once, not on every forward.
    """
    d_in, d_hid = w1.shape
    d_out = w2.shape[1]
    hid_pad = _round_up(d_hid, 128)   # 500 -> 512: lane-dense intermediate
    out_pad = _round_up(d_out, 128)   # 300 -> 384: lane-dense (unmasked) store

    w1p = jnp.pad(w1, ((0, 0), (0, hid_pad - d_hid)))
    b1p = jnp.pad(b1, (0, hid_pad - d_hid)).reshape(1, hid_pad)
    w2p = jnp.pad(w2, ((0, hid_pad - d_hid), (0, out_pad - d_out)))
    b2p = jnp.pad(b2, (0, out_pad - d_out)).reshape(1, out_pad)
    gp = jnp.pad(gamma, (0, out_pad - d_out)).reshape(1, out_pad)
    bp = jnp.pad(beta, (0, out_pad - d_out)).reshape(1, out_pad)

    if use_bf16:
        # bf16 MXU operands; biases / affine params stay f32 (added post-accum).
        w1p = w1p.astype(jnp.bfloat16)
        w2p = w2p.astype(jnp.bfloat16)

    return dict(w1=w1p, b1=b1p, w2=w2p, b2=b2p, gamma=gp, beta=bp,
                d_in=d_in, d_hid=d_hid, d_out=d_out,
                hid_pad=hid_pad, out_pad=out_pad)


def _choose_row_tile(m_rows, row_tile, min_steps=2):
    """Row tile: multiple of 8, as large as row_tile, but keep >=2 grid steps
    (when possible) so the parallel axis can shard across both v7x TensorCores."""
    tm = _round_up(min(row_tile, _round_up(m_rows, 8)), 8)
    if m_rows > 8 and pl.cdiv(m_rows, tm) < min_steps:
        tm = max(8, _round_up(pl.cdiv(m_rows, min_steps), 8))
    return tm


def text_encoder_head(texts, params, *, row_tile=512, eps=1e-5, padded_output=False):
    """LayerNorm(ReLU(Linear2(ReLU(Linear1(texts))))) for texts of shape (B, L, Din).

    `params` comes from prepare_params(). If padded_output=True the raw
    (B*L, out_pad) lane-dense slab is returned (no trailing slice/reshape),
    which is the cheapest layout for a downstream Pallas consumer.
    """
    B, L, d_in = texts.shape
    assert d_in == params["d_in"]
    # (8,128) block constraint: the Din axis must be a lane multiple (768 is).
    assert d_in % 128 == 0, "input feature dim must be a multiple of 128"
    d_out = params["d_out"]
    hid_pad = params["hid_pad"]
    out_pad = params["out_pad"]

    # Flatten (B, L) -> M rows; contiguous reshape, no data movement.
    M = B * L
    x2 = texts.reshape(M, d_in)

    tm = _choose_row_tile(M, row_tile)
    grid = (pl.cdiv(M, tm),)   # ragged last tile handled by Pallas store masking

    itemsize = x2.dtype.itemsize
    w_itemsize = params["w1"].dtype.itemsize
    flops = 2 * M * d_in * hid_pad + 2 * M * hid_pad * out_pad
    bytes_accessed = (
        M * d_in * itemsize                      # activations in
        + d_in * hid_pad * w_itemsize            # W1 (resident)
        + hid_pad * out_pad * w_itemsize         # W2 (resident)
        + M * out_pad * 4                        # output
        + (hid_pad + 3 * out_pad) * 4            # biases / gamma / beta
    )
    cost = pl.CostEstimate(flops=flops, transcendentals=M,
                           bytes_accessed=bytes_accessed)

    kernel = functools.partial(text_mlp_kernel, inv_n=1.0 / float(d_out), eps=eps)

    out = pl.pallas_call(
        kernel,
        out_shape=jax.ShapeDtypeStruct((M, out_pad), jnp.float32),
        grid_spec=pltpu.PrefetchScalarGridSpec(
            num_scalar_prefetch=0,
            grid=grid,
            in_specs=[
                pl.BlockSpec((tm, d_in), lambda i: (i, 0)),          # activations (row-tiled)
                pl.BlockSpec((d_in, hid_pad), lambda i: (0, 0)),     # W1 (VMEM-resident)
                pl.BlockSpec((1, hid_pad), lambda i: (0, 0)),        # b1
                pl.BlockSpec((hid_pad, out_pad), lambda i: (0, 0)),  # W2 (VMEM-resident)
                pl.BlockSpec((1, out_pad), lambda i: (0, 0)),        # b2
                pl.BlockSpec((1, out_pad), lambda i: (0, 0)),        # gamma
                pl.BlockSpec((1, out_pad), lambda i: (0, 0)),        # beta
            ],
            out_specs=pl.BlockSpec((tm, out_pad), lambda i: (i, 0)),
        ),
        compiler_params=pltpu.CompilerParams(
            dimension_semantics=("parallel",)),
        cost_estimate=cost,
    )(x2, params["w1"], params["b1"], params["w2"], params["b2"],
      params["gamma"], params["beta"])

    if padded_output:
        return out                               # (M, out_pad) lane-dense slab
    return out[:, :d_out].reshape(B, L, d_out)   # drop-in TextEncoder layout


def reference(texts, w1, b1, w2, b2, gamma, beta, eps=1e-5):
    h = jax.nn.relu(jnp.matmul(texts, w1) + b1)
    y = jax.nn.relu(jnp.matmul(h, w2) + b2)
    mean = jnp.mean(y, axis=-1, keepdims=True)
    var = jnp.mean((y - mean) ** 2, axis=-1, keepdims=True)
    return (y - mean) * jax.lax.rsqrt(var + eps) * gamma + beta


if __name__ == "__main__":
    # Small batch/sequence; feature dims match the TextEncoder defaults
    # (input_size=768, linear1 -> 500, out_size=300).
    B, L = 2, 8
    D_IN, D_HID, D_OUT = 768, 500, 300

    key = jax.random.PRNGKey(0)
    k_x, k_w1, k_b1, k_w2, k_b2 = jax.random.split(key, 5)

    # "texts" stands in for the (already BERT-encoded + span-pooled) embeddings.
    texts = jax.random.normal(k_x, (B, L, D_IN), dtype=jnp.float32)

    # nn.Linear-style uniform init (bound = 1/sqrt(fan_in)).
    bound1 = 1.0 / math.sqrt(D_IN)
    w1 = jax.random.uniform(k_w1, (D_IN, D_HID), minval=-bound1, maxval=bound1,
                            dtype=jnp.float32)
    b1 = jax.random.uniform(k_b1, (D_HID,), minval=-bound1, maxval=bound1,
                            dtype=jnp.float32)
    bound2 = 1.0 / math.sqrt(D_HID)
    w2 = jax.random.uniform(k_w2, (D_HID, D_OUT), minval=-bound2, maxval=bound2,
                            dtype=jnp.float32)
    b2 = jax.random.uniform(k_b2, (D_OUT,), minval=-bound2, maxval=bound2,
                            dtype=jnp.float32)
    # LayerNorm default affine init.
    gamma = jnp.ones((D_OUT,), dtype=jnp.float32)
    beta = jnp.zeros((D_OUT,), dtype=jnp.float32)

    ref = reference(texts, w1, b1, w2, b2, gamma, beta)

    # Default perf path: bf16 weights (prepared once), bf16 activations
    # (upstream encoder would emit bf16 directly -> halved activation DMA).
    params_bf16 = prepare_params(w1, b1, w2, b2, gamma, beta, use_bf16=True)
    out_bf16 = text_encoder_head(texts.astype(jnp.bfloat16), params_bf16)
    out_bf16 = jax.block_until_ready(out_bf16)
    assert out_bf16.shape == (B, L, D_OUT)
    assert bool(jnp.all(jnp.isfinite(out_bf16)))
    assert float(jnp.max(jnp.abs(out_bf16 - ref))) < 0.5

    # f32 path: exact semantics of the torch module (tolerance leaves headroom
    # for MXU f32 pass-count differences vs XLA's matmul).
    params_f32 = prepare_params(w1, b1, w2, b2, gamma, beta, use_bf16=False)
    out_f32 = jax.block_until_ready(text_encoder_head(texts, params_f32))
    assert out_f32.shape == (B, L, D_OUT)
    assert jnp.allclose(out_f32, ref, atol=1e-2, rtol=1e-2)

    # Padded-output layout for downstream Pallas consumers (no trailing slice).
    out_pad = jax.block_until_ready(
        text_encoder_head(texts, params_f32, padded_output=True))
    assert out_pad.shape == (B * L, params_f32["out_pad"])
    assert jnp.allclose(out_pad[:, :D_OUT].reshape(B, L, D_OUT), ref,
                        atol=1e-2, rtol=1e-2)
    # padded lanes are exactly zero
    assert float(jnp.max(jnp.abs(out_pad[:, D_OUT:]))) == 0.0

    print("KERNEL_OK")
</pallas_src>

<mosaic_0001>
module attributes {stable_mosaic.version = 11 : i64} {
  func.func @text_mlp_kernel(%arg0: i32, %arg1: memref<8x768xbf16, #tpu.memory_space<vmem>>, %arg2: memref<768x512xbf16, #tpu.memory_space<vmem>>, %arg3: memref<1x512xf32, #tpu.memory_space<vmem>>, %arg4: memref<512x384xbf16, #tpu.memory_space<vmem>>, %arg5: memref<1x384xf32, #tpu.memory_space<vmem>>, %arg6: memref<1x384xf32, #tpu.memory_space<vmem>>, %arg7: memref<1x384xf32, #tpu.memory_space<vmem>>, %arg8: memref<8x384xf32, #tpu.memory_space<vmem>>) attributes {dimension_semantics = [#tpu.dimension_semantics<parallel>], iteration_bounds = array<i64: 2>, scalar_prefetch = 0 : i64, scratch_operands = 0 : i64, tpu.core_type = #tpu.core_type<tc>, window_params = [{transform_indices = @transform_0, window_bounds = array<i64: 8, 768>}, {pipeline_mode = #tpu.pipeline_mode<synchronous>, transform_indices = @transform_1, window_bounds = array<i64: 768, 512>}, {pipeline_mode = #tpu.pipeline_mode<synchronous>, transform_indices = @transform_2, window_bounds = array<i64: 1, 512>}, {pipeline_mode = #tpu.pipeline_mode<synchronous>, transform_indices = @transform_3, window_bounds = array<i64: 512, 384>}, {pipeline_mode = #tpu.pipeline_mode<synchronous>, transform_indices = @transform_4, window_bounds = array<i64: 1, 384>}, {pipeline_mode = #tpu.pipeline_mode<synchronous>, transform_indices = @transform_5, window_bounds = array<i64: 1, 384>}, {pipeline_mode = #tpu.pipeline_mode<synchronous>, transform_indices = @transform_6, window_bounds = array<i64: 1, 384>}, {transform_indices = @transform_7, window_bounds = array<i64: 8, 384>}]} {
    %c0 = arith.constant 0 : index
    %c0_0 = arith.constant 0 : index
    %0 = vector.load %arg1[%c0, %c0_0] : memref<8x768xbf16, #tpu.memory_space<vmem>>, vector<8x768xbf16>
    %c0_1 = arith.constant 0 : index
    %c0_2 = arith.constant 0 : index
    %1 = vector.load %arg2[%c0_1, %c0_2] : memref<768x512xbf16, #tpu.memory_space<vmem>>, vector<768x512xbf16>
    %cst = arith.constant dense<0.000000e+00> : vector<8x512xf32>
    %2 = tpu.matmul %0, %1, %cst {dimension_numbers = #tpu.dot_dimension_numbers<[1], [0], [0], [1], [0, 0, 1, 1], [], []>} : vector<8x768xbf16>, vector<768x512xbf16>, vector<8x512xf32> -> vector<8x512xf32>
    %c0_3 = arith.constant 0 : index
    %c0_4 = arith.constant 0 : index
    %3 = vector.load %arg3[%c0_3, %c0_4] : memref<1x512xf32, #tpu.memory_space<vmem>>, vector<1x512xf32>
    %4 = vector.broadcast %3 : vector<1x512xf32> to vector<8x512xf32>
    %5 = arith.addf %2, %4 : vector<8x512xf32>
    %cst_5 = arith.constant 0.000000e+00 : f32
    %6 = vector.broadcast %cst_5 : f32 to vector<8x512xf32>
    %7 = arith.maximumf %5, %6 : vector<8x512xf32>
    %8 = arith.truncf %7 : vector<8x512xf32> to vector<8x512xbf16>
    %c0_6 = arith.constant 0 : index
    %c0_7 = arith.constant 0 : index
    %9 = vector.load %arg4[%c0_6, %c0_7] : memref<512x384xbf16, #tpu.memory_space<vmem>>, vector<512x384xbf16>
    %cst_8 = arith.constant dense<0.000000e+00> : vector<8x384xf32>
    %10 = tpu.matmul %8, %9, %cst_8 {dimension_numbers = #tpu.dot_dimension_numbers<[1], [0], [0], [1], [0, 0, 1, 1], [], []>} : vector<8x512xbf16>, vector<512x384xbf16>, vector<8x384xf32> -> vector<8x384xf32>
    %c0_9 = arith.constant 0 : index
    %c0_10 = arith.constant 0 : index
    %11 = vector.load %arg5[%c0_9, %c0_10] : memref<1x384xf32, #tpu.memory_space<vmem>>, vector<1x384xf32>
    %12 = vector.broadcast %11 : vector<1x384xf32> to vector<8x384xf32>
    %13 = arith.addf %10, %12 : vector<8x384xf32>
    %cst_11 = arith.constant 0.000000e+00 : f32
    %14 = vector.broadcast %cst_11 : f32 to vector<8x384xf32>
    %15 = arith.maximumf %13, %14 : vector<8x384xf32>
    %cst_12 = arith.constant dense<0.000000e+00> : vector<8xf32>
    %16 = vector.multi_reduction <add>, %15, %cst_12 [1] : vector<8x384xf32> to vector<8xf32>
    %17 = vector.shape_cast %16 : vector<8xf32> to vector<8x1xf32>
    %cst_13 = arith.constant 0.00333333341 : f32
    %18 = vector.broadcast %cst_13 : f32 to vector<8x1xf32>
    %19 = arith.mulf %17, %18 : vector<8x1xf32>
    %20 = arith.mulf %15, %15 : vector<8x384xf32>
    %cst_14 = arith.constant dense<0.000000e+00> : vector<8xf32>
    %21 = vector.multi_reduction <add>, %20, %cst_14 [1] : vector<8x384xf32> to vector<8xf32>
    %22 = vector.shape_cast %21 : vector<8xf32> to vector<8x1xf32>
    %cst_15 = arith.constant 0.00333333341 : f32
    %23 = vector.broadcast %cst_15 : f32 to vector<8x1xf32>
    %24 = arith.mulf %22, %23 : vector<8x1xf32>
    %25 = arith.mulf %19, %19 : vector<8x1xf32>
    %26 = arith.subf %24, %25 : vector<8x1xf32>
    %27 = vector.broadcast %19 : vector<8x1xf32> to vector<8x384xf32>
    %28 = arith.subf %15, %27 : vector<8x384xf32>
    %cst_16 = arith.constant 9.99999974E-6 : f32
    %29 = vector.broadcast %cst_16 : f32 to vector<8x1xf32>
    %30 = arith.addf %26, %29 : vector<8x1xf32>
    %31 = math.rsqrt %30 : vector<8x1xf32>
    %32 = vector.broadcast %31 : vector<8x1xf32> to vector<8x384xf32>
    %33 = arith.mulf %28, %32 : vector<8x384xf32>
    %c0_17 = arith.constant 0 : index
    %c0_18 = arith.constant 0 : index
    %34 = vector.load %arg6[%c0_17, %c0_18] : memref<1x384xf32, #tpu.memory_space<vmem>>, vector<1x384xf32>
    %35 = vector.broadcast %34 : vector<1x384xf32> to vector<8x384xf32>
    %36 = arith.mulf %33, %35 : vector<8x384xf32>
    %c0_19 = arith.constant 0 : index
    %c0_20 = arith.constant 0 : index
    %37 = vector.load %arg7[%c0_19, %c0_20] : memref<1x384xf32, #tpu.memory_space<vmem>>, vector<1x384xf32>
    %38 = vector.broadcast %37 : vector<1x384xf32> to vector<8x384xf32>
    %39 = arith.addf %36, %38 : vector<8x384xf32>
    %c0_21 = arith.constant 0 : index
    %c0_22 = arith.constant 0 : index
    %40 = vector.load %arg8[%c0_21, %c0_22] : memref<8x384xf32, #tpu.memory_space<vmem>>, vector<8x384xf32>
    tpu.vector_store %arg8[%c0_21, %c0_22], %39 {strides = array<i32>} : memref<8x384xf32, #tpu.memory_space<vmem>>, vector<8x384xf32>,
    return
  }
  func.func @transform_0(%arg0: i32) -> (i32, i32) {
    %c0_i32 = arith.constant 0 : i32
    %c0_i32_0 = arith.constant 0 : i32
    return %arg0, %c0_i32 : i32, i32
  }
  func.func @transform_1(%arg0: i32) -> (i32, i32) {
    %c0_i32 = arith.constant 0 : i32
    %c0_i32_0 = arith.constant 0 : i32
    %c0_i32_1 = arith.constant 0 : i32
    return %c0_i32, %c0_i32_0 : i32, i32
  }
  func.func @transform_2(%arg0: i32) -> (i32, i32) {
    %c0_i32 = arith.constant 0 : i32
    %c0_i32_0 = arith.constant 0 : i32
    %c0_i32_1 = arith.constant 0 : i32
    return %c0_i32, %c0_i32_0 : i32, i32
  }
  func.func @transform_3(%arg0: i32) -> (i32, i32) {
    %c0_i32 = arith.constant 0 : i32
    %c0_i32_0 = arith.constant 0 : i32
    %c0_i32_1 = arith.constant 0 : i32
    return %c0_i32, %c0_i32_0 : i32, i32
  }
  func.func @transform_4(%arg0: i32) -> (i32, i32) {
    %c0_i32 = arith.constant 0 : i32
    %c0_i32_0 = arith.constant 0 : i32
    %c0_i32_1 = arith.constant 0 : i32
    return %c0_i32, %c0_i32_0 : i32, i32
  }
  func.func @transform_5(%arg0: i32) -> (i32, i32) {
    %c0_i32 = arith.constant 0 : i32
    %c0_i32_0 = arith.constant 0 : i32
    %c0_i32_1 = arith.constant 0 : i32
    return %c0_i32, %c0_i32_0 : i32, i32
  }
  func.func @transform_6(%arg0: i32) -> (i32, i32) {
    %c0_i32 = arith.constant 0 : i32
    %c0_i32_0 = arith.constant 0 : i32
    %c0_i32_1 = arith.constant 0 : i32
    return %c0_i32, %c0_i32_0 : i32, i32
  }
  func.func @transform_7(%arg0: i32) -> (i32, i32) {
    %c0_i32 = arith.constant 0 : i32
    %c0_i32_0 = arith.constant 0 : i32
    return %arg0, %c0_i32 : i32, i32
  }
}

</mosaic_0001>

<bundles_post_ra>
// kernel: tpu_custom_call.1
= control target key start
LH: loop header
LB: loop body
LE: loop exit
PB: predicated region body
PF: predicated region fallthrough
CT: control target
= control target key end

     0   :  { %s5005_s0 = inlined_call_operand.hbm [shape: bf16[16,768], index: 0, kind: input, shape index: {}]   ;;  %s5006_s1 = inlined_call_operand.hbm [shape: bf16[768,512], index: 1, kind: input, shape index: {}]   ;;  %s5007_s2 = inlined_call_operand.hbm [shape: f32[1,512], index: 2, kind: input, shape index: {}]   ;;  %s5008_s3 = inlined_call_operand.hbm [shape: bf16[512,384], index: 3, kind: input, shape index: {}]   ;;  %s5009_s4 = inlined_call_operand.vmem [shape: f32[1,384], index: 4, kind: input, shape index: {}]   ;;  %s5010_s5 = inlined_call_operand.hbm [shape: f32[1,384], index: 5, kind: input, shape index: {}]   ;;  %s5011_s6 = inlined_call_operand.hbm [shape: f32[1,384], index: 6, kind: input, shape index: {}]   ;;  %s5012_s7 = inlined_call_operand.hbm [shape: f32[16,384], index: 7, kind: output, shape index: {}]  }
   0x1   :  { %5013 = sst [smem:[#allocation19_spill]] %s5006_s1 }
   0x2   :  { %5014 = sst [smem:[#allocation20_spill]] %s5007_s2 }
   0x3   :  { %5015 = sst [smem:[#allocation21_spill]] %s5008_s3 }
   0x4   :  { %5016 = sst [smem:[#allocation22_spill]] %s5010_s5 }
   0x5   :  { %12 = vsyncpa [#allocation3], 0 }
   0x6   :  { %14 = vsyncpa [#allocation3 + $0x1], 0 }
   0x7   :  { %15 = vsyncpa [#allocation6], 0 }
   0x8   :  { %16 = vsyncpa [#allocation9], 0 }
   0x9   :  { %17 = vsyncpa [#allocation12], 0 }
   0xa   :  { %18 = vsyncpa [#allocation4], 0 }
   0xb   :  { %20 = vsyncpa [#allocation4 + $0x1], 0  ;;  %s4753_s24 = smov 0   ;;  %s4755_s25 = smov 0  }
   0xc   :  { %s4757_s26 = smov 0   ;;  %s4759_s27 = smov 0  }
   0xd LB: > { %s5017_s1 = sld [smem:[#allocation19_spill]]  ;;  %s4777_s8 = sadd.s32 4294967295, %s4702_s27   ;;  %s4702_s27 = sphi %s4759_s27, %s5031_s27   ;;  %s4698_s26 = sphi %s4757_s26, %s5030_s26   ;;  %s4694_s25 = sphi %s4755_s25, %s5029_s25   ;;  %s4690_s24 = sphi %s4753_s24, %s5028_s24  }
   0xe   : > { %p2880_p0 = scmp.ge.s32.totalorder %s4702_s27, 1  ;;  %p47_p1 = scmp.eq.s32.totalorder %s4777_s8, 0 }
   0xf   : > { %p209_p2 = scmp.lt.s32.totalorder %s4702_s27, 3  ;;  %s4704_s10 = smov [#allocation5]  }
  0x10   : > { %s222_s11 = sshll.u32 %s4704_s10, 4  ;;  %s5019_s3 = sld [smem:[#allocation21_spill]]  ;;  %s223_s11 = int_to_ptr.vmem [resolvable:$true] %s222_s11 }
  0x11   : > { %p4782_p3 = pnand %p2880_p0, %p209_p2  ;;  %s4705_s16 = smov [#allocation8]  }
  0x12   : > { %s248_s17 = sshll.u32 %s4705_s16, 4  ;;  %s4706_s18 = smov 256   ;;  %s249_s17 = int_to_ptr.vmem [resolvable:$true] %s248_s17 }
  0x13   : > { %s220_s30 = sshll.u32 %s5017_s1, 4  ;;  %p4365_p4 = pneg %p4782_p3  ;;  %s221_s30 = int_to_ptr.hbm [resolvable:$true] %s220_s30 }
  0x14   : > { %s4707_s19 = smov 16   ;;  %s4708_s20 = smov 192  }
  0x15   : > { %p4794_p6 = pnand %p4365_p4, %p47_p1  ;;  %s4709_s21 = smov 12  }
  0x16   : > { %s246_s14 = sshll.u32 %s5019_s3, 4  ;;  %s5021_s2 = sld [smem:[#allocation20_spill]]  ;;  %s247_s14 = int_to_ptr.hbm [resolvable:$true] %s246_s14 }
  0x17   : > { %4368 = dma.hbm_to_vmem [thread:$0]  (!%p4794_p6), %s221_s30, 24576, %s223_s11, [#allocation6], %s4706_s18, %s4706_s18, %s4707_s19  }
  0x18   : > { %4374 = dma.hbm_to_vmem [thread:$0]  (!%p4794_p6), %s247_s14, 12288, %s249_s17, [#allocation9], %s4708_s20, %s4708_s20, %s4709_s21  }
  0x19   : > { %s4710_s29 = smov [#allocation7]   ;;  %s5022_s5 = sld [smem:[#allocation22_spill]] }
  0x1a   : > { %s237_s10 = sshll.u32 %s4710_s29, 4  ;;  %s4711_s11 = smov [#allocation10]   ;;  %s238_s10 = int_to_ptr.vmem [resolvable:$true] %s237_s10 }
  0x1b   : > { %s266_s14 = sshll.u32 %s4711_s11, 4  ;;  %s276_s18 = sshll.u32 %s5011_s6, 4  ;;  %s267_s14 = int_to_ptr.vmem [resolvable:$true] %s266_s14  ;;  %s277_s18 = int_to_ptr.hbm [resolvable:$true] %s276_s18 }
  0x1c   : > { %s235_s28 = sshll.u32 %s5021_s2, 4  ;;  %s4712_s19 = smov [#allocation11]   ;;  %s236_s28 = int_to_ptr.hbm [resolvable:$true] %s235_s28 }
  0x1d   : > { %4371 = dma.hbm_to_vmem [thread:$0]  (!%p4794_p6), %s236_s28, 64, %s238_s10, [#allocation6]  }
  0x1e   : > { %s278_s20 = sshll.u32 %s4712_s19, 4  ;;  %s2879_s21 = sadd.s32 4294967294, %s4702_s27   ;;  %s279_s20 = int_to_ptr.vmem [resolvable:$true] %s278_s20 }
  0x1f   : > { %s264_s30 = sshll.u32 %s5022_s5, 4  ;;  %s4819_s22 = sadd.s32 1, %s4702_s27   ;;  %s265_s30 = int_to_ptr.hbm [resolvable:$true] %s264_s30 }
  0x20   : > { %4377 = dma.hbm_to_vmem [thread:$0]  (!%p4794_p6), %s265_s30, 48, %s267_s14, [#allocation9]  }
  0x21   : > { %4380 = dma.hbm_to_vmem [thread:$0]  (!%p4794_p6), %s277_s18, 48, %s279_s20, [#allocation12]  }
  0x22   : > { %s33_s23 = sadd.s32 1, %s4698_s26  ;;  %s30_s28 = ssub.s32 %s4702_s27, %s4819_s22 }
  0x23   : > { %p40_p7 = scmp.ne.s32.totalorder %s4698_s26, %s4694_s25  ;;  %p31_p8 = scmp.eq.s32.totalorder %s30_s28, 0 }
  0x24   : > { %p41_p9 = scmp.eq.s32.totalorder %s4702_s27, 0  ;;  %p46_p10 = scmp.ne.s32.totalorder %s4694_s25, %s4690_s24 }
  0x25   : > { %p196_p11 = scmp.eq.s32.totalorder %s4777_s8, 1  ;;  %p202_p2 = scmp.eq.s32.totalorder %s2879_s21, 1 }
  0x26   : > { %s4831_s29 = scalar_select %p31_p8, %s4698_s26, %s33_s23  }
  0x27   : > { %p42_p12 = por %p41_p9, %p40_p7  ;;  %p4835_p13 = por %p47_p1, %p46_p10 }
  0x28   : > { %p4839_p0 = por %p196_p11, %p40_p7  ;;  %p4394_p4 = scmp.lt.s32.totalorder %s4702_s27, 2 }
  0x29   : > { %s289_s12 = sand.u32 1, %s4698_s26   ;;  %p4845_p6 = por %p202_p2, %p46_p10 }
  0x2a   : > { %s4337_s30 = smul.u32 24, %s289_s12  ;;  %p4849_p8 = pnand %p4394_p4, %p42_p12 }
  0x2b   : > { %s4338_s14 = smul.u32 24, %s4702_s27  ;;  %s290_s23 = scalar_lea.sflag [#allocation3], %s289_s12 }
  0x2c   : > { %s293_s19 = scalar_lea.vmem [#allocation2], %s4337_s30  ;;  %p4598_p9 = pneg %p4849_p8 }
  0x2d   : > { %s298_s18 = scalar_lea.hbm %s5005_s0, %s4338_s14  ;;  %s302_s20 = sshll.u32 %s293_s19, 4  ;;  %s303_s20 = int_to_ptr.vmem [resolvable:$true] %s302_s20 }
  0x2e   : > { %s300_s21 = sshll.u32 %s298_s18, 4  ;;  %s4601_s5 = scalar_lea.hbm %s5005_s0, 48  ;;  %s301_s21 = int_to_ptr.hbm [resolvable:$true] %s300_s21 }
  0x2f   : > { %s4594_s28 = sshra.s32 %s301_s21, 4  ;;  %s4595_s28 = int_to_ptr.hbm [resolvable:$true] %s4594_s28 }
  0x30   : > { %s4596_s1 = scalar_lea.hbm %s4595_s28, 24  ;;  %p4602_p12 = scmp.lt.s32.totalorder %s4595_s28, %s5005_s0 }
  0x31   : > { %p4597_p7 = scmp.ne.s32.totalorder %s4595_s28, %s4596_s1  ;;  %p4603_p2 = scmp.lt.s32.totalorder %s4601_s5, %s4596_s1 }
  0x33   : > { %p4599_p10 = pnand %p4598_p9, %p4597_p7  ;;  %p4604_p4 = por %p4603_p2, %p4602_p12 }
  0x35   : > { %p4600_p11 = pneg %p4599_p10 }
  0x37   : > { %p4605_p5 = pnand %p4604_p4, %p4600_p11 }
  0x39   : > { %4608 = shalt.err (!%p4605_p5)
}
  0x3a   : > { %4384 = dma.hbm_to_vmem [thread:$0]  (!%p4849_p8), %s301_s21, 384, %s303_s20, %s290_s23  }
  0x3b   : > { %311 = sbr.rel (%p4782_p3) target bundleno = 736 (0x2e0), region = 48  ;;  %s4870_s12 = sand.u32 (!%p4782_p3), 1, %s4694_s25  }
  0x3c   : > { %s4339_s2 = smul.u32 (!%p4782_p3), 24, %s4870_s12  ;;  %s314_s3 = scalar_lea.sflag (!%p4782_p3), [#allocation3], %s4870_s12 }
  0x3e   : > { %s4876_s1 = scalar_lea.vmem (!%p4782_p3), [#allocation2], %s4339_s2 }
  0x40   : > { %4669 = dma.done.wait (%p4835_p13), %s314_s3, 384  }
  0x41   : > { %4671 = vsyncadd (%p4835_p13), %s314_s3, 4294966912 }
  0x42   : > { %4673 = dma.done.wait (%p47_p1), [#allocation6], 24640  }
  0x43   : > { %4675 = vsyncadd (%p47_p1), [#allocation6], 4294942656 }
  0x44   : > { %4677 = dma.done.wait (%p47_p1), [#allocation9], 12336  }
  0x45   : > { %4679 = vsyncadd (%p47_p1), [#allocation9], 4294954960 }
  0x46   : > { %4681 = dma.done.wait (%p47_p1), [#allocation12], 48  }
  0x47   : > { %4683 = vsyncadd (%p47_p1), [#allocation12], 4294967248  ;;  %v3008_v0 = vld [vmem:[#allocation5 + $0xe0] sm:$0xf]  ;;  %v4079_v1 = vld [vmem:[#allocation5 + $0xec] sm:$0xf0] }
  0x48   : > { %v3136_v2 = vld [vmem:[#allocation5 + $0x1e0] sm:$0xf]  ;;  %v3009_v3 = vor.u32 %v4079_v1, %v3008_v0  ;;  %v4111_v4 = vld [vmem:[#allocation5 + $0x1ec] sm:$0xf0]  ;;  %s4340_s15 = smul.u32 24, %s4777_s8  ;;  %s373_s17 = scalar_lea.vmem [#allocation13], %s4339_s2 }
  0x49   : > { %v3264_v5 = vld [vmem:[#allocation5 + $0x2e0] sm:$0xf]  ;;  %v4143_v6 = vld [vmem:[#allocation5 + $0x2ec] sm:$0xf0]  ;;  %v3137_v7 = vor.u32 %v4111_v4, %v3136_v2  ;;  %s2758_s18 = sshll.u32 %s373_s17, 4  ;;  %s2745_s20 = scalar_lea.sflag [#allocation4], %s4870_s12  ;;  %s2759_s18 = int_to_ptr.vmem [resolvable:$true] %s2758_s18 }
  0x4a   : > { %v3265_v8 = vor.u32 %v4143_v6, %v3264_v5  ;;  %v3392_v9 = vld [vmem:[#allocation5 + $0x3e0] sm:$0xf]  ;;  %v4175_v10 = vld [vmem:[#allocation5 + $0x3ec] sm:$0xf0]  ;;  %1560 = vmatpush.bf16.msra.mxu0 %v3009_v3  ;;  %s2756_s8 = scalar_lea.hbm %s5012_s7, %s4340_s15  ;;  %s4644_s14 = scalar_lea.hbm %s5012_s7, 48 }
  0x4b   : > { %v2992_v11 = vld [vmem:[#allocation5 + $0xc0] sm:$0xf]  ;;  %v3393_v12 = vor.u32 %v4175_v10, %v3392_v9  ;;  %v4075_v13 = vld [vmem:[#allocation5 + $0xcc] sm:$0xf0]  ;;  %1573 = vmatpush.bf16.msra.mxu1 %v3137_v7  ;;  %s2760_s19 = sshll.u32 %s2756_s8, 4  ;;  %s2761_s19 = int_to_ptr.hbm [resolvable:$true] %s2760_s19 }
  0x4c   : > { %v3120_v14 = vld [vmem:[#allocation5 + $0x1c0] sm:$0xf]  ;;  %v4107_v15 = vld [vmem:[#allocation5 + $0x1cc] sm:$0xf0]  ;;  %1586 = vmatpush.bf16.msra.mxu2 %v3265_v8  ;;  %v2993_v16 = vor.u32 %v4075_v13, %v2992_v11  ;;  %s4638_s21 = sshra.s32 %s2761_s19, 4  ;;  %s4639_s21 = int_to_ptr.hbm [resolvable:$true] %s4638_s21 }
  0x4d   : > { %v3121_v17 = vor.u32 %v4107_v15, %v3120_v14  ;;  %v3248_v18 = vld [vmem:[#allocation5 + $0x2c0] sm:$0xf]  ;;  %v4139_v19 = vld [vmem:[#allocation5 + $0x2cc] sm:$0xf0]  ;;  %1599 = vmatpush.bf16.msra.mxu3 %v3393_v12  ;;  %s4640_s23 = scalar_lea.hbm %s4639_s21, 24  ;;  %p4645_p13 = scmp.lt.s32.totalorder %s4639_s21, %s5012_s7 }
  0x4e   : > { %v3376_v20 = vld [vmem:[#allocation5 + $0x3c0] sm:$0xf]  ;;  %v3249_v21 = vor.u32 %v4139_v19, %v3248_v18  ;;  %v4171_v22 = vld [vmem:[#allocation5 + $0x3cc] sm:$0xf0]  ;;  %1561 = vmatpush.bf16.msra.mxu0 %v2993_v16  ;;  %p4641_p1 = scmp.ne.s32.totalorder %s4639_s21, %s4640_s23  ;;  %p4646_p8 = scmp.lt.s32.totalorder %s4644_s14, %s4640_s23 }
  0x4f   : > { %v2976_v23 = vld [vmem:[#allocation5 + $0xa0] sm:$0xf]  ;;  %v4071_v24 = vld [vmem:[#allocation5 + $0xac] sm:$0xf0]  ;;  %v3377_v25 = vor.u32 %v4171_v22, %v3376_v20  ;;  %1574 = vmatpush.bf16.msra.mxu1 %v3121_v17 }
  0x50   : > { %v3104_v26 = vld [vmem:[#allocation5 + $0x1a0] sm:$0xf]  ;;  %v4103_v27 = vld [vmem:[#allocation5 + $0x1ac] sm:$0xf0]  ;;  %v2977_v29 = vor.u32 %v4071_v24, %v2976_v23  ;;  %1587 = vmatpush.bf16.msra.mxu2 %v3249_v21  ;;  %p4642_p3 = pnand %p4641_p1, %p4839_p0  ;;  %p4647_p7 = por %p4646_p8, %p4645_p13 }
  0x51   : > { %v3232_v28 = vld [vmem:[#allocation5 + $0x2a0] sm:$0xf]  ;;  %v4135_v30 = vld [vmem:[#allocation5 + $0x2ac] sm:$0xf0]  ;;  %v3105_v33 = vor.u32 %v4103_v27, %v3104_v26  ;;  %1600 = vmatpush.bf16.msra.mxu3 %v3377_v25 }
  0x52   : > { %v3360_v31 = vld [vmem:[#allocation5 + $0x3a0] sm:$0xf]  ;;  %v4167_v32 = vld [vmem:[#allocation5 + $0x3ac] sm:$0xf0]  ;;  %v3233_v34 = vor.u32 %v4135_v30, %v3232_v28  ;;  %1562 = vmatpush.bf16.msra.mxu0 %v2977_v29  ;;  %p4643_p5 = pneg %p4642_p3 }
  0x53   : > { %v2960_v35 = vld [vmem:[#allocation5 + $0x80] sm:$0xf]  ;;  %v4067_v36 = vld [vmem:[#allocation5 + $0x8c] sm:$0xf0]  ;;  %v3361_v38 = vor.u32 %v4167_v32, %v3360_v31  ;;  %1575 = vmatpush.bf16.msra.mxu1 %v3105_v33  ;;  %v4077_v33 = vld [vmem:[#allocation5 + $0xe4] sm:$0xf] }
  0x54   : > { %v3088_v37 = vld [vmem:[#allocation5 + $0x180] sm:$0xf]  ;;  %v4099_v39 = vld [vmem:[#allocation5 + $0x18c] sm:$0xf0]  ;;  %v2961_v44 = vor.u32 %v4067_v36, %v2960_v35  ;;  %1588 = vmatpush.bf16.msra.mxu2 %v3233_v34  ;;  %v3010_v34 = vld [vmem:[#allocation5 + $0xf0] sm:$0xf0]  ;;  %p4648_p9 = pnand %p4647_p7, %p4643_p5 }
  0x55   : > { %v3216_v40 = vld [vmem:[#allocation5 + $0x280] sm:$0xf]  ;;  %v4131_v41 = vld [vmem:[#allocation5 + $0x28c] sm:$0xf0]  ;;  %v3089_v45 = vor.u32 %v4099_v39, %v3088_v37  ;;  %1601 = vmatpush.bf16.msra.mxu3 %v3361_v38  ;;  %v4109_v37 = vld [vmem:[#allocation5 + $0x1e4] sm:$0xf] }
  0x56   : > { %v3344_v42 = vld [vmem:[#allocation5 + $0x380] sm:$0xf]  ;;  %v4163_v43 = vld [vmem:[#allocation5 + $0x38c] sm:$0xf0]  ;;  %v3217_v46 = vor.u32 %v4131_v41, %v3216_v40  ;;  %1563 = vmatpush.bf16.msra.mxu0 %v2961_v44  ;;  %v3138_v38 = vld [vmem:[#allocation5 + $0x1f0] sm:$0xf0] }
  0x57   : > { %v2944_v47 = vld [vmem:[#allocation5 + $0x60] sm:$0xf]  ;;  %v4063_v48 = vld [vmem:[#allocation5 + $0x6c] sm:$0xf0]  ;;  %v3345_v50 = vor.u32 %v4163_v43, %v3344_v42  ;;  %1576 = vmatpush.bf16.msra.mxu1 %v3089_v45  ;;  %v3013_v42 = vor.u32 %v4077_v33, %v3010_v34  ;;  %v3074_v33 = vld [vmem:[#allocation5 + $0x170] sm:$0xf0] }
  0x58   : > { %v3072_v49 = vld [vmem:[#allocation5 + $0x160] sm:$0xf]  ;;  %v4095_v51 = vld [vmem:[#allocation5 + $0x16c] sm:$0xf0]  ;;  %v2945_v56 = vor.u32 %v4063_v48, %v2944_v47  ;;  %1589 = vmatpush.bf16.msra.mxu2 %v3217_v46  ;;  %v3141_v46 = vor.u32 %v4109_v37, %v3138_v38  ;;  %v4073_v48 = vld [vmem:[#allocation5 + $0xc4] sm:$0xf] }
  0x59   : > { %v3200_v52 = vld [vmem:[#allocation5 + $0x260] sm:$0xf]  ;;  %v4127_v53 = vld [vmem:[#allocation5 + $0x26c] sm:$0xf0]  ;;  %v3073_v57 = vor.u32 %v4095_v51, %v3072_v49  ;;  %1602 = vmatpush.bf16.msra.mxu3 %v3345_v50  ;;  %v2994_v49 = vld [vmem:[#allocation5 + $0xd0] sm:$0xf0] }
  0x5a   : > { %v3328_v54 = vld [vmem:[#allocation5 + $0x360] sm:$0xf]  ;;  %v4159_v55 = vld [vmem:[#allocation5 + $0x36c] sm:$0xf0]  ;;  %v3201_v58 = vor.u32 %v4127_v53, %v3200_v52  ;;  %1564 = vmatpush.bf16.msra.mxu0 %v2945_v56  ;;  %v4105_v50 = vld [vmem:[#allocation5 + $0x1c4] sm:$0xf] }
  0x5b   : > { %v2928_v59 = vld [vmem:[#allocation5 + $0x40] sm:$0xf]  ;;  %v4059_v60 = vld [vmem:[#allocation5 + $0x4c] sm:$0xf0]  ;;  %v3329_v62 = vor.u32 %v4159_v55, %v3328_v54  ;;  %1577 = vmatpush.bf16.msra.mxu1 %v3073_v57  ;;  %v3122_v51 = vld [vmem:[#allocation5 + $0x1d0] sm:$0xf0]  ;;  %v2997_v55 = vor.u32 %v4073_v48, %v2994_v49 }
  0x5c   : > { %v3056_v61 = vld [vmem:[#allocation5 + $0x140] sm:$0xf]  ;;  %v4091_v63 = vld [vmem:[#allocation5 + $0x14c] sm:$0xf0]  ;;  %v2929_v4 = vor.u32 %v4059_v60, %v2928_v59  ;;  %1590 = vmatpush.bf16.msra.mxu2 %v3201_v58  ;;  %v3125_v59 = vor.u32 %v4105_v50, %v3122_v51  ;;  %v4069_v60 = vld [vmem:[#allocation5 + $0xa4] sm:$0xf] }
  0x5d   : > { %v3184_v0 = vld [vmem:[#allocation5 + $0x240] sm:$0xf]  ;;  %v4123_v1 = vld [vmem:[#allocation5 + $0x24c] sm:$0xf0]  ;;  %v3057_v5 = vor.u32 %v4091_v63, %v3056_v61  ;;  %1603 = vmatpush.bf16.msra.mxu3 %v3329_v62  ;;  %v2978_v61 = vld [vmem:[#allocation5 + $0xb0] sm:$0xf0] }
  0x5e   : > { %v3312_v2 = vld [vmem:[#allocation5 + $0x340] sm:$0xf]  ;;  %v4155_v3 = vld [vmem:[#allocation5 + $0x34c] sm:$0xf0]  ;;  %v3185_v6 = vor.u32 %v4123_v1, %v3184_v0  ;;  %1565 = vmatpush.bf16.msra.mxu0 %v2929_v4  ;;  %v4101_v62 = vld [vmem:[#allocation5 + $0x1a4] sm:$0xf]  ;;  %v2981_v4 = vor.u32 %v4069_v60, %v2978_v61 }
  0x5f   : > { %v2912_v7 = vld [vmem:[#allocation5 + $0x20] sm:$0xf]  ;;  %v4055_v8 = vld [vmem:[#allocation5 + $0x2c] sm:$0xf0]  ;;  %v3313_v10 = vor.u32 %v4155_v3, %v3312_v2  ;;  %1578 = vmatpush.bf16.msra.mxu1 %v3057_v5  ;;  %v3106_v63 = vld [vmem:[#allocation5 + $0x1b0] sm:$0xf0] }
  0x60   : > { %v3040_v9 = vld [vmem:[#allocation5 + $0x120] sm:$0xf]  ;;  %v4087_v11 = vld [vmem:[#allocation5 + $0x12c] sm:$0xf0]  ;;  %v2913_v16 = vor.u32 %v4055_v8, %v2912_v7  ;;  %1591 = vmatpush.bf16.msra.mxu2 %v3185_v6 }
  0x61   : > { %v3168_v12 = vld [vmem:[#allocation5 + $0x220] sm:$0xf]  ;;  %v4119_v13 = vld [vmem:[#allocation5 + $0x22c] sm:$0xf0]  ;;  %v3041_v19 = vor.u32 %v4087_v11, %v3040_v9  ;;  %1604 = vmatpush.bf16.msra.mxu3 %v3313_v10  ;;  %v3109_v11 = vor.u32 %v4101_v62, %v3106_v63 }
  0x62   : > { %v3296_v14 = vld [vmem:[#allocation5 + $0x320] sm:$0xf]  ;;  %v4151_v15 = vld [vmem:[#allocation5 + $0x32c] sm:$0xf0]  ;;  %v3169_v20 = vor.u32 %v4119_v13, %v3168_v12  ;;  %1566 = vmatpush.bf16.msra.mxu0 %v2913_v16  ;;  %v4065_v13 = vld [vmem:[#allocation5 + $0x84] sm:$0xf] }
  0x63   : > { %v2896_v17 = vld [vmem:[#allocation5] sm:$0xf]  ;;  %v4051_v18 = vld [vmem:[#allocation5 + $0xc] sm:$0xf0]  ;;  %v3297_v24 = vor.u32 %v4151_v15, %v3296_v14  ;;  %1579 = vmatpush.bf16.msra.mxu1 %v3041_v19  ;;  %v2962_v14 = vld [vmem:[#allocation5 + $0x90] sm:$0xf0] }
  0x64   : > { %v3024_v21 = vld [vmem:[#allocation5 + $0x100] sm:$0xf]  ;;  %v4083_v22 = vld [vmem:[#allocation5 + $0x10c] sm:$0xf0]  ;;  %v2897_v31 = vor.u32 %v4051_v18, %v2896_v17  ;;  %1592 = vmatpush.bf16.msra.mxu2 %v3169_v20  ;;  %v4097_v16 = vld [vmem:[#allocation5 + $0x184] sm:$0xf] }
  0x65   : > { %v3152_v23 = vld [vmem:[#allocation5 + $0x200] sm:$0xf]  ;;  %v4115_v25 = vld [vmem:[#allocation5 + $0x20c] sm:$0xf0]  ;;  %v3025_v35 = vor.u32 %v4083_v22, %v3024_v21  ;;  %1605 = vmatpush.bf16.msra.mxu3 %v3297_v24  ;;  %v3090_v17 = vld [vmem:[#allocation5 + $0x190] sm:$0xf0]  ;;  %v2965_v24 = vor.u32 %v4065_v13, %v2962_v14 }
  0x66   : > { %v3280_v26 = vld [vmem:[#allocation5 + $0x300] sm:$0xf]  ;;  %v4147_v27 = vld [vmem:[#allocation5 + $0x30c] sm:$0xf0]  ;;  %v3153_v36 = vor.u32 %v4115_v25, %v3152_v23  ;;  %1567 = vmatpush.bf16.msra.mxu0 %v2897_v31  ;;  %v2946_v31 = vld [vmem:[#allocation5 + $0x70] sm:$0xf0] }
  0x67   : > { %v3520_v28 = vld [vmem:[#allocation5 + $0x4e0] sm:$0xf]  ;;  %v4207_v29 = vld [vmem:[#allocation5 + $0x4ec] sm:$0xf0]  ;;  %v3281_v39 = vor.u32 %v4147_v27, %v3280_v26  ;;  %1580 = vmatpush.bf16.msra.mxu1 %v3025_v35  ;;  %v3522_v13 = vld [vmem:[#allocation5 + $0x4f0] sm:$0xf0] }
  0x68   : > { %v3648_v30 = vld [vmem:[#allocation5 + $0x5e0] sm:$0xf]  ;;  %v4239_v32 = vld [vmem:[#allocation5 + $0x5ec] sm:$0xf0]  ;;  %v3521_v40 = vor.u32 %v4207_v29, %v3520_v28  ;;  %1593 = vmatpush.bf16.msra.mxu2 %v3153_v36  ;;  %v3093_v28 = vor.u32 %v4097_v16, %v3090_v17  ;;  %v4237_v17 = vld [vmem:[#allocation5 + $0x5e4] sm:$0xf] }
  0x69   : > { %v3649_v41 = vor.u32 %v4239_v32, %v3648_v30  ;;  %v3504_v43 = vld [vmem:[#allocation5 + $0x4c0] sm:$0xf]  ;;  %v4203_v44 = vld [vmem:[#allocation5 + $0x4cc] sm:$0xf0]  ;;  %1606 = vmatpush.bf16.msra.mxu3 %v3281_v39  ;;  %v4061_v30 = vld [vmem:[#allocation5 + $0x64] sm:$0xf] }
  0x6a   : > { %v3632_v45 = vld [vmem:[#allocation5 + $0x5c0] sm:$0xf]  ;;  %v4235_v47 = vld [vmem:[#allocation5 + $0x5cc] sm:$0xf0]  ;;  %1612 = vmatpush.bf16.msrb.mxu0 %v3521_v40  ;;  %v3505_v52 = vor.u32 %v4203_v44, %v3504_v43  ;;  %v4093_v32 = vld [vmem:[#allocation5 + $0x164] sm:$0xf]  ;;  %v2949_v36 = vor.u32 %v4061_v30, %v2946_v31 }
  0x6b   : > { %v3488_v53 = vld [vmem:[#allocation5 + $0x4a0] sm:$0xf]  ;;  %1625 = vmatpush.bf16.msrb.mxu1 %v3649_v41  ;;  %v3633_v54 = vor.u32 %v4235_v47, %v3632_v45  ;;  %v4199_v56 = vld [vmem:[#allocation5 + $0x4ac] sm:$0xf0]  ;;  %v3077_v40 = vor.u32 %v4093_v32, %v3074_v33  ;;  %v2930_v43 = vld [vmem:[#allocation5 + $0x50] sm:$0xf0] }
  0x6c   : > { %1638 = vmatpush.bf16.msrb.mxu2 %v3013_v42  ;;  %v3616_v57 = vld [vmem:[#allocation5 + $0x5a0] sm:$0xf]  ;;  %v4231_v58 = vld [vmem:[#allocation5 + $0x5ac] sm:$0xf0]  ;;  %v3489_v0 = vor.u32 %v4199_v56, %v3488_v53  ;;  %v4057_v42 = vld [vmem:[#allocation5 + $0x44] sm:$0xf] }
  0x6d   : > { %1651 = vmatpush.bf16.msrb.mxu3 %v3141_v46  ;;  %v3617_v1 = vor.u32 %v4231_v58, %v3616_v57  ;;  %v375_v2 = vld [vmem:[%s4876_s1 + $0x8] sm:$0xff]  ;;  %v374_v3 = vld [vmem:[%s4876_s1] sm:$0xff]  ;;  %v3472_v5 = vld [vmem:[#allocation5 + $0x480] sm:$0xf]  ;;  %v2933_v48 = vor.u32 %v4057_v42, %v2930_v43 }
  0x6e   : > { %1613 = vmatpush.bf16.msrb.mxu0 %v3505_v52  ;;  %v4195_v6 = vld [vmem:[#allocation5 + $0x48c] sm:$0xf0]  ;;  %v3600_v7 = vld [vmem:[#allocation5 + $0x580] sm:$0xf]  ;;  %v584_v8 = vunpack.c.l.b16 %v375_v2  ;;  %v582_v9 = vunpack.c.l.b16 %v374_v3  ;;  %v585_v10 = vunpack.c.h.b16 %v375_v2  ;;  %v583_v15 = vunpack.c.h.b16 %v374_v3  ;;  %v4089_v44 = vld [vmem:[#allocation5 + $0x144] sm:$0xf] }
  0x6f   : > { %1626 = vmatpush.bf16.msrb.mxu1 %v3633_v54  ;;  %v4227_v12 = vld [vmem:[#allocation5 + $0x58c] sm:$0xf0]  ;;  %v3473_v21 = vor.u32 %v4195_v6, %v3472_v5  ;;  %v3456_v25 = vld [vmem:[#allocation5 + $0x460] sm:$0xf]  ;;  %v3058_v45 = vld [vmem:[#allocation5 + $0x150] sm:$0xf0] }
  0x70   : > { %1639 = vmatpush.bf16.msrb.mxu2 %v2997_v55  ;;  %v4896_v18 = vpack.c.b16 %v584_v8, %v584_v8  ;;  %v4898_v19 = vpack.c.b16 %v582_v9, %v582_v9  ;;  %v4900_v20 = vpack.c.b16 %v585_v10, %v585_v10  ;;  %v4902_v22 = vpack.c.b16 %v583_v15, %v583_v15  ;;  %v4191_v26 = vld [vmem:[#allocation5 + $0x46c] sm:$0xf0]  ;;  %v3584_v27 = vld [vmem:[#allocation5 + $0x560] sm:$0xf]  ;;  %v4053_v54 = vld [vmem:[#allocation5 + $0x24] sm:$0xf] }
  0x71   : > { %1652 = vmatpush.bf16.msrb.mxu3 %v3125_v59  ;;  %v3601_v23 = vor.u32 %v4227_v12, %v3600_v7  ;;  %v4223_v29 = vld [vmem:[#allocation5 + $0x56c] sm:$0xf0]  ;;  %v3457_v34 = vor.u32 %v4191_v26, %v3456_v25  ;;  %v3440_v37 = vld [vmem:[#allocation5 + $0x440] sm:$0xf]  ;;  %v3061_v52 = vor.u32 %v4089_v44, %v3058_v45  ;;  %v2914_v55 = vld [vmem:[#allocation5 + $0x30] sm:$0xf0] }
  0x72   : > { %1614 = vmatpush.bf16.msrb.mxu0 %v3489_v0  ;;  %1594 = vmatmul.bf16.vlgmr.msra.gmra.mxu2 %v4896_v18  ;;  %v3585_v35 = vor.u32 %v4223_v29, %v3584_v27  ;;  %v4187_v38 = vld [vmem:[#allocation5 + $0x44c] sm:$0xf0]  ;;  %v3568_v39 = vld [vmem:[#allocation5 + $0x540] sm:$0xf]  ;;  %v4085_v56 = vld [vmem:[#allocation5 + $0x124] sm:$0xf]  ;;  %v2917_v63 = vor.u32 %v4053_v54, %v2914_v55 }
  0x73   : > { %1627 = vmatpush.bf16.msrb.mxu1 %v3617_v1  ;;  %1568 = vmatmul.bf16.vlgmr.msra.gmra.mxu0 %v4898_v19  ;;  %v4219_v41 = vld [vmem:[#allocation5 + $0x54c] sm:$0xf0]  ;;  %v3441_v46 = vor.u32 %v4187_v38, %v3440_v37  ;;  %v3424_v49 = vld [vmem:[#allocation5 + $0x420] sm:$0xf]  ;;  %v3042_v57 = vld [vmem:[#allocation5 + $0x130] sm:$0xf0] }
  0x74   : > { %1640 = vmatpush.bf16.msrb.mxu2 %v2981_v4  ;;  %1607 = vmatmul.bf16.vlgmr.msra.gmra.mxu3 %v4900_v20  ;;  %v3569_v47 = vor.u32 %v4219_v41, %v3568_v39  ;;  %v4183_v50 = vld [vmem:[#allocation5 + $0x42c] sm:$0xf0]  ;;  %v3552_v51 = vld [vmem:[#allocation5 + $0x520] sm:$0xf]  ;;  %v4049_v1 = vld [vmem:[#allocation5 + $0x4] sm:$0xf]  ;;  %v3045_v3 = vor.u32 %v4085_v56, %v3042_v57 }
  0x75   : > { %1653 = vmatpush.bf16.msrb.mxu3 %v3109_v11  ;;  %1581 = vmatmul.bf16.vlgmr.msra.gmra.mxu1 %v4902_v22  ;;  %v4215_v53 = vld [vmem:[#allocation5 + $0x52c] sm:$0xf0]  ;;  %v3425_v58 = vor.u32 %v4183_v50, %v3424_v49  ;;  %v3408_v59 = vld [vmem:[#allocation5 + $0x400] sm:$0xf]  ;;  %v2898_v4 = vld [vmem:[#allocation5 + $0x10] sm:$0xf0] }
  0x76   : > { %1615 = vmatpush.bf16.msrb.mxu0 %v3473_v21  ;;  %v4179_v60 = vld [vmem:[#allocation5 + $0x40c] sm:$0xf0]  ;;  %v3536_v61 = vld [vmem:[#allocation5 + $0x500] sm:$0xf]  ;;  %v3553_v62 = vor.u32 %v4215_v53, %v3552_v51  ;;  %v4081_v5 = vld [vmem:[#allocation5 + $0x104] sm:$0xf]  ;;  %v2901_v16 = vor.u32 %v4049_v1, %v2898_v4 }
  0x77   : > { %1628 = vmatpush.bf16.msrb.mxu1 %v3601_v23  ;;  %v4211_v0 = vld [vmem:[#allocation5 + $0x50c] sm:$0xf0]  ;;  %v376_v2 = vld [vmem:[%s4876_s1 + $0x10] sm:$0xff]  ;;  %v3026_v6 = vld [vmem:[#allocation5 + $0x110] sm:$0xf0]  ;;  %v3409_v10 = vor.u32 %v4179_v60, %v3408_v59 }
  0x78   : > { %1641 = vmatpush.bf16.msrb.mxu2 %v2965_v24  ;;  %v4141_v7 = vld [vmem:[#allocation5 + $0x2e4] sm:$0xf]  ;;  %v3266_v8 = vld [vmem:[#allocation5 + $0x2f0] sm:$0xf0]  ;;  %v586_v14 = vunpack.c.l.b16 %v376_v2  ;;  %v3537_v15 = vor.u32 %v4211_v0, %v3536_v61  ;;  %v587_v23 = vunpack.c.h.b16 %v376_v2  ;;  %v3029_v24 = vor.u32 %v4081_v5, %v3026_v6 }
  0x79   : > { %1654 = vmatpush.bf16.msrb.mxu3 %v3093_v28  ;;  %v4173_v9 = vld [vmem:[#allocation5 + $0x3e4] sm:$0xf]  ;;  %v3394_v11 = vld [vmem:[#allocation5 + $0x3f0] sm:$0xf0]  ;;  %v3269_v25 = vor.u32 %v4141_v7, %v3266_v8 }
  0x7a   : > { %1616 = vmatpush.bf16.msrb.mxu0 %v3457_v34  ;;  %v4205_v12 = vld [vmem:[#allocation5 + $0x4e4] sm:$0xf]  ;;  %v3650_v21 = vld [vmem:[#allocation5 + $0x5f0] sm:$0xf0]  ;;  %v3397_v26 = vor.u32 %v4173_v9, %v3394_v11  ;;  %v4911_v38 = vpack.c.b16 %v587_v23, %v587_v23 }
  0x7b   : > { %1629 = vmatpush.bf16.msrb.mxu1 %v3585_v35  ;;  %v3525_v27 = vor.u32 %v4205_v12, %v3522_v13  ;;  %v4137_v28 = vld [vmem:[#allocation5 + $0x2c4] sm:$0xf]  ;;  %v3250_v29 = vld [vmem:[#allocation5 + $0x2d0] sm:$0xf0]  ;;  %v3653_v31 = vor.u32 %v4237_v17, %v3650_v21  ;;  %v4909_v35 = vpack.c.b16 %v586_v14, %v586_v14 }
  0x7c   : > { %1642 = vmatpush.bf16.msrb.mxu2 %v2949_v36  ;;  %v4169_v30 = vld [vmem:[#allocation5 + $0x3c4] sm:$0xf]  ;;  %v3378_v32 = vld [vmem:[#allocation5 + $0x3d0] sm:$0xf0]  ;;  %v3253_v39 = vor.u32 %v4137_v28, %v3250_v29 }
  0x7d   : > { %1655 = vmatpush.bf16.msrb.mxu3 %v3077_v40  ;;  %v4201_v33 = vld [vmem:[#allocation5 + $0x4c4] sm:$0xf]  ;;  %v3506_v34 = vld [vmem:[#allocation5 + $0x4d0] sm:$0xf0]  ;;  %v3381_v40 = vor.u32 %v4169_v30, %v3378_v32 }
  0x7e   : > { %1617 = vmatpush.bf16.msrb.mxu0 %v3441_v46  ;;  %v4233_v36 = vld [vmem:[#allocation5 + $0x5c4] sm:$0xf]  ;;  %v3634_v37 = vld [vmem:[#allocation5 + $0x5d0] sm:$0xf0]  ;;  %v3509_v41 = vor.u32 %v4201_v33, %v3506_v34 }
  0x7f   : > { %1630 = vmatpush.bf16.msrb.mxu1 %v3569_v47  ;;  %v4133_v42 = vld [vmem:[#allocation5 + $0x2a4] sm:$0xf]  ;;  %v3234_v43 = vld [vmem:[#allocation5 + $0x2b0] sm:$0xf0]  ;;  %v3637_v45 = vor.u32 %v4233_v36, %v3634_v37 }
  0x80   : > { %1643 = vmatpush.bf16.msrb.mxu2 %v2933_v48  ;;  %v4165_v44 = vld [vmem:[#allocation5 + $0x3a4] sm:$0xf]  ;;  %v3362_v46 = vld [vmem:[#allocation5 + $0x3b0] sm:$0xf0]  ;;  %v3237_v51 = vor.u32 %v4133_v42, %v3234_v43 }
  0x81   : > { %1656 = vmatpush.bf16.msrb.mxu3 %v3061_v52  ;;  %v4197_v47 = vld [vmem:[#allocation5 + $0x4a4] sm:$0xf]  ;;  %v3490_v48 = vld [vmem:[#allocation5 + $0x4b0] sm:$0xf0]  ;;  %v3365_v52 = vor.u32 %v4165_v44, %v3362_v46 }
  0x82   : > { %1618 = vmatpush.bf16.msrb.mxu0 %v3425_v58  ;;  %v4229_v49 = vld [vmem:[#allocation5 + $0x5a4] sm:$0xf]  ;;  %v3618_v50 = vld [vmem:[#allocation5 + $0x5b0] sm:$0xf0]  ;;  %v3493_v53 = vor.u32 %v4197_v47, %v3490_v48 }
  0x83   : > { %1631 = vmatpush.bf16.msrb.mxu1 %v3553_v62  ;;  %v4129_v54 = vld [vmem:[#allocation5 + $0x284] sm:$0xf]  ;;  %v3218_v55 = vld [vmem:[#allocation5 + $0x290] sm:$0xf0]  ;;  %v3621_v57 = vor.u32 %v4229_v49, %v3618_v50 }
  0x84   : > { %1644 = vmatpush.bf16.msrb.mxu2 %v2917_v63  ;;  %v4161_v56 = vld [vmem:[#allocation5 + $0x384] sm:$0xf]  ;;  %v3346_v58 = vld [vmem:[#allocation5 + $0x390] sm:$0xf0]  ;;  %v3221_v63 = vor.u32 %v4129_v54, %v3218_v55  ;;  %v4080_v54 = vld [vmem:[#allocation5 + $0xf4] sm:$0xf0] }
  0x85   : > { %1657 = vmatpush.bf16.msrb.mxu3 %v3045_v3  ;;  %v4193_v59 = vld [vmem:[#allocation5 + $0x484] sm:$0xf]  ;;  %v3474_v60 = vld [vmem:[#allocation5 + $0x490] sm:$0xf0]  ;;  %v3349_v0 = vor.u32 %v4161_v56, %v3346_v58  ;;  %v3144_v55 = vld [vmem:[#allocation5 + $0x1e8] sm:$0xf] }
  0x86   : > { %1619 = vmatpush.bf16.msrb.mxu0 %v3409_v10  ;;  %v4225_v61 = vld [vmem:[#allocation5 + $0x584] sm:$0xf]  ;;  %v3602_v62 = vld [vmem:[#allocation5 + $0x590] sm:$0xf0]  ;;  %v3477_v1 = vor.u32 %v4193_v59, %v3474_v60  ;;  %v3272_v58 = vld [vmem:[#allocation5 + $0x2e8] sm:$0xf] }
  0x87   : > { %1632 = vmatpush.bf16.msrb.mxu1 %v3537_v15  ;;  %v4125_v2 = vld [vmem:[#allocation5 + $0x264] sm:$0xf]  ;;  %v3202_v3 = vld [vmem:[#allocation5 + $0x270] sm:$0xf0]  ;;  %v3605_v5 = vor.u32 %v4225_v61, %v3602_v62  ;;  %v4144_v59 = vld [vmem:[#allocation5 + $0x2f4] sm:$0xf0] }
  0x88   : > { %1645 = vmatpush.bf16.msrb.mxu2 %v2901_v16  ;;  %v4157_v4 = vld [vmem:[#allocation5 + $0x364] sm:$0xf]  ;;  %v3330_v6 = vld [vmem:[#allocation5 + $0x370] sm:$0xf0]  ;;  %v3205_v11 = vor.u32 %v4125_v2, %v3202_v3  ;;  %v3400_v62 = vld [vmem:[#allocation5 + $0x3e8] sm:$0xf]  ;;  %v3273_v3 = vor.u32 %v4144_v59, %v3272_v58 }
  0x89   : > { %1658 = vmatpush.bf16.msrb.mxu3 %v3029_v24  ;;  %1620 = vmatmul.bf16.vlgmr.msrb.gmra.mxu0 %v4909_v35  ;;  %v4189_v7 = vld [vmem:[#allocation5 + $0x464] sm:$0xf]  ;;  %v3458_v8 = vld [vmem:[#allocation5 + $0x470] sm:$0xf0]  ;;  %v3333_v12 = vor.u32 %v4157_v4, %v3330_v6  ;;  %v3000_v4 = vld [vmem:[#allocation5 + $0xc8] sm:$0xf] }
  0x8a   : > { %1664 = vmatpush.bf16.msra.mxu0 %v3269_v25  ;;  %1633 = vmatmul.bf16.vlgmr.msrb.gmra.mxu1 %v4911_v38  ;;  %v4221_v9 = vld [vmem:[#allocation5 + $0x564] sm:$0xf]  ;;  %v3586_v10 = vld [vmem:[#allocation5 + $0x570] sm:$0xf0]  ;;  %v3461_v13 = vor.u32 %v4189_v7, %v3458_v8  ;;  %v3128_v6 = vld [vmem:[#allocation5 + $0x1c8] sm:$0xf] }
  0x8b   : > { %1677 = vmatpush.bf16.msra.mxu1 %v3397_v26  ;;  %1646 = vmatmul.bf16.vlgmr.msrb.gmra.mxu2 %v4898_v19  ;;  %v4121_v14 = vld [vmem:[#allocation5 + $0x244] sm:$0xf]  ;;  %v3186_v15 = vld [vmem:[#allocation5 + $0x250] sm:$0xf0]  ;;  %v3589_v17 = vor.u32 %v4221_v9, %v3586_v10  ;;  %v4108_v8 = vld [vmem:[#allocation5 + $0x1d4] sm:$0xf0] }
  0x8c   : > { %1690 = vmatpush.bf16.msra.mxu2 %v3525_v27  ;;  %1659 = vmatmul.bf16.vlgmr.msrb.gmra.mxu3 %v4902_v22  ;;  %v4153_v16 = vld [vmem:[#allocation5 + $0x344] sm:$0xf]  ;;  %v3314_v21 = vld [vmem:[#allocation5 + $0x350] sm:$0xf0]  ;;  %v3189_v27 = vor.u32 %v4121_v14, %v3186_v15  ;;  %v3256_v9 = vld [vmem:[#allocation5 + $0x2c8] sm:$0xf]  ;;  %v3129_v14 = vor.u32 %v4108_v8, %v3128_v6 }
  0x8d   : > { %1703 = vmatpush.bf16.msra.mxu3 %v3653_v31  ;;  %v4185_v23 = vld [vmem:[#allocation5 + $0x444] sm:$0xf]  ;;  %v3442_v24 = vld [vmem:[#allocation5 + $0x450] sm:$0xf0]  ;;  %v3317_v28 = vor.u32 %v4153_v16, %v3314_v21  ;;  %v4140_v10 = vld [vmem:[#allocation5 + $0x2d4] sm:$0xf0] }
  0x8e   : > { %1665 = vmatpush.bf16.msra.mxu0 %v3253_v39  ;;  %v4217_v25 = vld [vmem:[#allocation5 + $0x544] sm:$0xf]  ;;  %v3570_v26 = vld [vmem:[#allocation5 + $0x550] sm:$0xf0]  ;;  %v3445_v29 = vor.u32 %v4185_v23, %v3442_v24  ;;  %v3257_v15 = vor.u32 %v4140_v10, %v3256_v9  ;;  %v2984_v16 = vld [vmem:[#allocation5 + $0xa8] sm:$0xf] }
  0x8f   : > { %1678 = vmatpush.bf16.msra.mxu1 %v3381_v40  ;;  %v4117_v30 = vld [vmem:[#allocation5 + $0x224] sm:$0xf]  ;;  %v3170_v31 = vld [vmem:[#allocation5 + $0x230] sm:$0xf0]  ;;  %v3573_v33 = vor.u32 %v4217_v25, %v3570_v26  ;;  %v3112_v21 = vld [vmem:[#allocation5 + $0x1a8] sm:$0xf] }
  0x90   : > { %1691 = vmatpush.bf16.msra.mxu2 %v3509_v41  ;;  %v4149_v32 = vld [vmem:[#allocation5 + $0x324] sm:$0xf]  ;;  %v3298_v34 = vld [vmem:[#allocation5 + $0x330] sm:$0xf0]  ;;  %v3173_v41 = vor.u32 %v4117_v30, %v3170_v31  ;;  %v4104_v24 = vld [vmem:[#allocation5 + $0x1b4] sm:$0xf0] }
  0x91   : > { %1704 = vmatpush.bf16.msra.mxu3 %v3637_v45  ;;  %v4181_v36 = vld [vmem:[#allocation5 + $0x424] sm:$0xf]  ;;  %v3426_v37 = vld [vmem:[#allocation5 + $0x430] sm:$0xf0]  ;;  %v3301_v44 = vor.u32 %v4149_v32, %v3298_v34  ;;  %v3240_v25 = vld [vmem:[#allocation5 + $0x2a8] sm:$0xf]  ;;  %v3113_v30 = vor.u32 %v4104_v24, %v3112_v21 }
  0x92   : > { %1666 = vmatpush.bf16.msra.mxu0 %v3237_v51  ;;  %v4213_v39 = vld [vmem:[#allocation5 + $0x524] sm:$0xf]  ;;  %v3554_v40 = vld [vmem:[#allocation5 + $0x530] sm:$0xf0]  ;;  %v3429_v45 = vor.u32 %v4181_v36, %v3426_v37  ;;  %v4136_v26 = vld [vmem:[#allocation5 + $0x2b4] sm:$0xf0] }
  0x93   : > { %1679 = vmatpush.bf16.msra.mxu1 %v3365_v52  ;;  %v4113_v42 = vld [vmem:[#allocation5 + $0x204] sm:$0xf]  ;;  %v3154_v43 = vld [vmem:[#allocation5 + $0x210] sm:$0xf0]  ;;  %v3557_v49 = vor.u32 %v4213_v39, %v3554_v40  ;;  %v3241_v31 = vor.u32 %v4136_v26, %v3240_v25  ;;  %v2968_v32 = vld [vmem:[#allocation5 + $0x88] sm:$0xf] }
  0x94   : > { %1692 = vmatpush.bf16.msra.mxu2 %v3493_v53  ;;  %v4145_v46 = vld [vmem:[#allocation5 + $0x304] sm:$0xf]  ;;  %v3282_v47 = vld [vmem:[#allocation5 + $0x310] sm:$0xf0]  ;;  %v3016_v53 = vld [vmem:[#allocation5 + $0xe8] sm:$0xf]  ;;  %v3157_v56 = vor.u32 %v4113_v42, %v3154_v43 }
  0x95   : > { %1705 = vmatpush.bf16.msra.mxu3 %v3621_v57  ;;  %v4177_v48 = vld [vmem:[#allocation5 + $0x404] sm:$0xf]  ;;  %v3410_v50 = vld [vmem:[#allocation5 + $0x410] sm:$0xf0]  ;;  %v4112_v57 = vld [vmem:[#allocation5 + $0x1f4] sm:$0xf0]  ;;  %v3285_v60 = vor.u32 %v4145_v46, %v3282_v47 }
  0x96   : > { %1667 = vmatpush.bf16.msra.mxu0 %v3221_v63  ;;  %v4209_v51 = vld [vmem:[#allocation5 + $0x504] sm:$0xf]  ;;  %v3538_v52 = vld [vmem:[#allocation5 + $0x510] sm:$0xf0]  ;;  %v3413_v61 = vor.u32 %v4177_v48, %v3410_v50  ;;  %v4176_v63 = vld [vmem:[#allocation5 + $0x3f4] sm:$0xf0]  ;;  %v3145_v2 = vor.u32 %v4112_v57, %v3144_v55 }
  0x97   : > { %1680 = vmatpush.bf16.msra.mxu1 %v3349_v0  ;;  %v3541_v0 = vor.u32 %v4209_v51, %v3538_v52  ;;  %v3401_v7 = vor.u32 %v4176_v63, %v3400_v62  ;;  %v3096_v34 = vld [vmem:[#allocation5 + $0x188] sm:$0xf]  ;;  %v4100_v37 = vld [vmem:[#allocation5 + $0x194] sm:$0xf0] }
  0x98   : > { %1693 = vmatpush.bf16.msra.mxu2 %v3477_v1  ;;  %v3017_v1 = vor.u32 %v4080_v54, %v3016_v53  ;;  %v3224_v39 = vld [vmem:[#allocation5 + $0x288] sm:$0xf]  ;;  %v4132_v40 = vld [vmem:[#allocation5 + $0x294] sm:$0xf0] }
  0x99   : > { %1706 = vmatpush.bf16.msra.mxu3 %v3605_v5  ;;  %v4076_v5 = vld [vmem:[#allocation5 + $0xd4] sm:$0xf0]  ;;  %v2952_v46 = vld [vmem:[#allocation5 + $0x68] sm:$0xf] }
  0x9a   : > { %1668 = vmatpush.bf16.msra.mxu0 %v3205_v11  ;;  %v3384_v11 = vld [vmem:[#allocation5 + $0x3c8] sm:$0xf]  ;;  %v4164_v42 = vld [vmem:[#allocation5 + $0x394] sm:$0xf0] }
  0x9b   : > { %1681 = vmatpush.bf16.msra.mxu1 %v3333_v12  ;;  %v4172_v12 = vld [vmem:[#allocation5 + $0x3d4] sm:$0xf0]  ;;  %v3080_v48 = vld [vmem:[#allocation5 + $0x168] sm:$0xf] }
  0x9c   : > { %1694 = vmatpush.bf16.msra.mxu2 %v3461_v13  ;;  %v3001_v13 = vor.u32 %v4076_v5, %v3000_v4  ;;  %v3385_v23 = vor.u32 %v4172_v12, %v3384_v11  ;;  %v4064_v47 = vld [vmem:[#allocation5 + $0x74] sm:$0xf0]  ;;  %v3208_v51 = vld [vmem:[#allocation5 + $0x268] sm:$0xf] }
  0x9d   : > { %1707 = vmatpush.bf16.msra.mxu3 %v3589_v17  ;;  %v4072_v17 = vld [vmem:[#allocation5 + $0xb4] sm:$0xf0]  ;;  %v3336_v53 = vld [vmem:[#allocation5 + $0x368] sm:$0xf]  ;;  %v2953_v55 = vor.u32 %v4064_v47, %v2952_v46 }
  0x9e   : > { %1669 = vmatpush.bf16.msra.mxu0 %v3189_v27  ;;  %v3368_v27 = vld [vmem:[#allocation5 + $0x3a8] sm:$0xf]  ;;  %v4096_v50 = vld [vmem:[#allocation5 + $0x174] sm:$0xf0] }
  0x9f   : > { %1682 = vmatpush.bf16.msra.mxu1 %v3317_v28  ;;  %v4168_v28 = vld [vmem:[#allocation5 + $0x3b4] sm:$0xf0]  ;;  %v2936_v58 = vld [vmem:[#allocation5 + $0x48] sm:$0xf] }
  0xa0   : > { %1695 = vmatpush.bf16.msra.mxu2 %v3445_v29  ;;  %v2985_v29 = vor.u32 %v4072_v17, %v2984_v16  ;;  %v3369_v36 = vor.u32 %v4168_v28, %v3368_v27  ;;  %v4128_v52 = vld [vmem:[#allocation5 + $0x274] sm:$0xf0]  ;;  %v3192_v63 = vld [vmem:[#allocation5 + $0x248] sm:$0xf] }
  0xa1   : > { %1708 = vmatpush.bf16.msra.mxu3 %v3573_v33  ;;  %v4068_v33 = vld [vmem:[#allocation5 + $0x94] sm:$0xf0]  ;;  %v3209_v57 = vor.u32 %v4128_v52, %v3208_v51  ;;  %v2920_v6 = vld [vmem:[#allocation5 + $0x28] sm:$0xf] }
  0xa2   : > { %1670 = vmatpush.bf16.msra.mxu0 %v3173_v41  ;;  %v3352_v41 = vld [vmem:[#allocation5 + $0x388] sm:$0xf]  ;;  %v2969_v43 = vor.u32 %v4068_v33, %v2968_v32  ;;  %v4160_v54 = vld [vmem:[#allocation5 + $0x374] sm:$0xf0] }
  0xa3   : > { %1683 = vmatpush.bf16.msra.mxu1 %v3301_v44  ;;  %v3097_v44 = vor.u32 %v4100_v37, %v3096_v34  ;;  %v4060_v59 = vld [vmem:[#allocation5 + $0x54] sm:$0xf0]  ;;  %v3048_v8 = vld [vmem:[#allocation5 + $0x128] sm:$0xf]  ;;  %v4078_v37 = vld [vmem:[#allocation5 + $0xec] sm:$0xf] }
  0xa4   : > { %1696 = vmatpush.bf16.msra.mxu2 %v3429_v45  ;;  %v3225_v45 = vor.u32 %v4132_v40, %v3224_v39  ;;  %v4092_v62 = vld [vmem:[#allocation5 + $0x154] sm:$0xf0]  ;;  %v3176_v11 = vld [vmem:[#allocation5 + $0x228] sm:$0xf]  ;;  %v3018_v39 = vld [vmem:[#allocation5 + $0xf8] sm:$0xf0] }
  0xa5   : > { %1709 = vmatpush.bf16.msra.mxu3 %v3557_v49  ;;  %v3353_v49 = vor.u32 %v4164_v42, %v3352_v41  ;;  %v4088_v10 = vld [vmem:[#allocation5 + $0x134] sm:$0xf0]  ;;  %v2904_v16 = vld [vmem:[#allocation5 + $0x8] sm:$0xf]  ;;  %v4110_v42 = vld [vmem:[#allocation5 + $0x1ec] sm:$0xf]  ;;  %v3021_v47 = vor.u32 %v4078_v37, %v3018_v39 }
  0xa6   : > { %1671 = vmatpush.bf16.msra.mxu0 %v3157_v56  ;;  %v3081_v56 = vor.u32 %v4096_v50, %v3080_v48  ;;  %v4120_v12 = vld [vmem:[#allocation5 + $0x234] sm:$0xf0]  ;;  %v3049_v21 = vor.u32 %v4088_v10, %v3048_v8  ;;  %v3032_v24 = vld [vmem:[#allocation5 + $0x108] sm:$0xf] }
  0xa7   : > { %1684 = vmatpush.bf16.msra.mxu1 %v3285_v60  ;;  %v3064_v60 = vld [vmem:[#allocation5 + $0x148] sm:$0xf]  ;;  %v4052_v17 = vld [vmem:[#allocation5 + $0x14] sm:$0xf0] }
  0xa8   : > { %1697 = vmatpush.bf16.msra.mxu2 %v3413_v61  ;;  %v3337_v61 = vor.u32 %v4160_v54, %v3336_v53  ;;  %v3065_v4 = vor.u32 %v4092_v62, %v3064_v60  ;;  %v4084_v25 = vld [vmem:[#allocation5 + $0x114] sm:$0xf0]  ;;  %v3160_v26 = vld [vmem:[#allocation5 + $0x208] sm:$0xf]  ;;  %v2905_v34 = vor.u32 %v4052_v17, %v2904_v16  ;;  %v4074_v53 = vld [vmem:[#allocation5 + $0xcc] sm:$0xf] }
  0xa9   : > { %1710 = vmatpush.bf16.msra.mxu3 %v3541_v0  ;;  %1672 = vmatmul.bf16.vlgmr.msra.gmra.mxu0 %v4896_v18  ;;  %v4124_v0 = vld [vmem:[#allocation5 + $0x254] sm:$0xf0]  ;;  %v3656_v33 = vld [vmem:[#allocation5 + $0x5e8] sm:$0xf]  ;;  %v3033_v40 = vor.u32 %v4084_v25, %v3032_v24  ;;  %v3002_v54 = vld [vmem:[#allocation5 + $0xd8] sm:$0xf0] }
  0xaa   : > { %1716 = vmatpush.bf16.msrb.mxu0 %v3017_v1  ;;  %1685 = vmatmul.bf16.vlgmr.msra.gmra.mxu1 %v4900_v20  ;;  %v3320_v1 = vld [vmem:[#allocation5 + $0x348] sm:$0xf]  ;;  %v3193_v5 = vor.u32 %v4124_v0, %v3192_v63  ;;  %v4116_v28 = vld [vmem:[#allocation5 + $0x214] sm:$0xf0]  ;;  %v3098_v16 = vld [vmem:[#allocation5 + $0x198] sm:$0xf0] }
  0xab   : > { %1729 = vmatpush.bf16.msrb.mxu1 %v3145_v2  ;;  %1698 = vmatmul.bf16.vlgmr.msra.gmra.mxu2 %v4909_v35  ;;  %v4156_v2 = vld [vmem:[#allocation5 + $0x354] sm:$0xf0]  ;;  %v3161_v41 = vor.u32 %v4116_v28, %v3160_v26  ;;  %v3512_v48 = vld [vmem:[#allocation5 + $0x4c8] sm:$0xf] }
  0xac   : > { %1742 = vmatpush.bf16.msrb.mxu2 %v3273_v3  ;;  %1711 = vmatmul.bf16.vlgmr.msra.gmra.mxu3 %v4911_v38  ;;  %v2937_v3 = vor.u32 %v4060_v59, %v2936_v58  ;;  %v3321_v9 = vor.u32 %v4156_v2, %v3320_v1  ;;  %v4208_v32 = vld [vmem:[#allocation5 + $0x4f4] sm:$0xf0]  ;;  %v3640_v50 = vld [vmem:[#allocation5 + $0x5c8] sm:$0xf]  ;;  %v3005_v59 = vor.u32 %v4074_v53, %v3002_v54  ;;  %v4070_v1 = vld [vmem:[#allocation5 + $0xac] sm:$0xf] }
  0xad   : > { %1755 = vmatpush.bf16.msrb.mxu3 %v3401_v7  ;;  %v4056_v7 = vld [vmem:[#allocation5 + $0x34] sm:$0xf0]  ;;  %v3496_v60 = vld [vmem:[#allocation5 + $0x4a8] sm:$0xf]  ;;  %v2986_v2 = vld [vmem:[#allocation5 + $0xb8] sm:$0xf0] }
  0xae   : > { %1717 = vmatpush.bf16.msrb.mxu0 %v3001_v13  ;;  %v3304_v13 = vld [vmem:[#allocation5 + $0x328] sm:$0xf]  ;;  %v4236_v52 = vld [vmem:[#allocation5 + $0x5d4] sm:$0xf0] }
  0xaf   : > { %1730 = vmatpush.bf16.msrb.mxu1 %v3129_v14  ;;  %v4152_v14 = vld [vmem:[#allocation5 + $0x334] sm:$0xf0]  ;;  %v3641_v58 = vor.u32 %v4236_v52, %v3640_v50  ;;  %v3624_v62 = vld [vmem:[#allocation5 + $0x5a8] sm:$0xf] }
  0xb0   : > { %1743 = vmatpush.bf16.msrb.mxu2 %v3257_v15  ;;  %v2921_v15 = vor.u32 %v4056_v7, %v2920_v6  ;;  %v3305_v27 = vor.u32 %v4152_v14, %v3304_v13  ;;  %v4232_v0 = vld [vmem:[#allocation5 + $0x5b4] sm:$0xf0]  ;;  %v2989_v7 = vor.u32 %v4070_v1, %v2986_v2  ;;  %v3480_v8 = vld [vmem:[#allocation5 + $0x488] sm:$0xf]  ;;  %v4066_v13 = vld [vmem:[#allocation5 + $0x8c] sm:$0xf] }
  0xb1   : > { %1756 = vmatpush.bf16.msrb.mxu3 %v3385_v23  ;;  %v3177_v23 = vor.u32 %v4120_v12, %v3176_v11  ;;  %v3625_v6 = vor.u32 %v4232_v0, %v3624_v62  ;;  %v3608_v10 = vld [vmem:[#allocation5 + $0x588] sm:$0xf]  ;;  %v4228_v12 = vld [vmem:[#allocation5 + $0x594] sm:$0xf0]  ;;  %v2970_v14 = vld [vmem:[#allocation5 + $0x98] sm:$0xf0] }
  0xb2   : > { %1718 = vmatpush.bf16.msrb.mxu0 %v2985_v29  ;;  %v3288_v29 = vld [vmem:[#allocation5 + $0x308] sm:$0xf]  ;;  %v4192_v25 = vld [vmem:[#allocation5 + $0x474] sm:$0xf0]  ;;  %v4050_v2 = vld [vmem:[#allocation5 + $0xc] sm:$0xf] }
  0xb3   : > { %1731 = vmatpush.bf16.msrb.mxu1 %v3113_v30  ;;  %v4148_v30 = vld [vmem:[#allocation5 + $0x314] sm:$0xf0]  ;;  %v3464_v24 = vld [vmem:[#allocation5 + $0x468] sm:$0xf] }
  0xb4   : > { %1744 = vmatpush.bf16.msrb.mxu2 %v3241_v31  ;;  %v3528_v31 = vld [vmem:[#allocation5 + $0x4e8] sm:$0xf]  ;;  %v4224_v28 = vld [vmem:[#allocation5 + $0x574] sm:$0xf0] }
  0xb5   : > { %1757 = vmatpush.bf16.msrb.mxu3 %v3369_v36  ;;  %v4240_v36 = vld [vmem:[#allocation5 + $0x5f4] sm:$0xf0]  ;;  %v3592_v26 = vld [vmem:[#allocation5 + $0x568] sm:$0xf] }
  0xb6   : > { %1719 = vmatpush.bf16.msrb.mxu0 %v2969_v43  ;;  %v3146_v43 = vld [vmem:[#allocation5 + $0x1f8] sm:$0xf0]  ;;  %v3657_v46 = vor.u32 %v4240_v36, %v3656_v33  ;;  %v3465_v33 = vor.u32 %v4192_v25, %v3464_v24  ;;  %v3448_v37 = vld [vmem:[#allocation5 + $0x448] sm:$0xf]  ;;  %v4188_v39 = vld [vmem:[#allocation5 + $0x454] sm:$0xf0] }
  0xb7   : > { %1732 = vmatpush.bf16.msrb.mxu1 %v3097_v44  ;;  %v3289_v44 = vor.u32 %v4148_v30, %v3288_v29  ;;  %v3149_v51 = vor.u32 %v4110_v42, %v3146_v43  ;;  %v4062_v29 = vld [vmem:[#allocation5 + $0x6c] sm:$0xf]  ;;  %v2954_v30 = vld [vmem:[#allocation5 + $0x78] sm:$0xf0]  ;;  %v4220_v42 = vld [vmem:[#allocation5 + $0x554] sm:$0xf0] }
  0xb8   : > { %1745 = vmatpush.bf16.msrb.mxu2 %v3225_v45  ;;  %v3529_v45 = vor.u32 %v4208_v32, %v3528_v31  ;;  %v4094_v31 = vld [vmem:[#allocation5 + $0x16c] sm:$0xf]  ;;  %v3082_v32 = vld [vmem:[#allocation5 + $0x178] sm:$0xf0]  ;;  %v2957_v36 = vor.u32 %v4062_v29, %v2954_v30  ;;  %v3432_v50 = vld [vmem:[#allocation5 + $0x428] sm:$0xf] }
  0xb9   : > { %1758 = vmatpush.bf16.msrb.mxu3 %v3353_v49  ;;  %v4204_v49 = vld [vmem:[#allocation5 + $0x4d4] sm:$0xf0]  ;;  %v4058_v43 = vld [vmem:[#allocation5 + $0x4c] sm:$0xf]  ;;  %v3560_v52 = vld [vmem:[#allocation5 + $0x528] sm:$0xf] }
  0xba   : > { %1720 = vmatpush.bf16.msrb.mxu0 %v2953_v55  ;;  %v4106_v55 = vld [vmem:[#allocation5 + $0x1cc] sm:$0xf]  ;;  %v4216_v54 = vld [vmem:[#allocation5 + $0x534] sm:$0xf0]  ;;  %v3544_v0 = vld [vmem:[#allocation5 + $0x508] sm:$0xf] }
  0xbb   : > { %1733 = vmatpush.bf16.msrb.mxu1 %v3081_v56  ;;  %v3130_v56 = vld [vmem:[#allocation5 + $0x1d8] sm:$0xf0]  ;;  %v3561_v62 = vor.u32 %v4216_v54, %v3560_v52  ;;  %v4212_v1 = vld [vmem:[#allocation5 + $0x514] sm:$0xf0]  ;;  %v4130_v52 = vld [vmem:[#allocation5 + $0x28c] sm:$0xf] }
  0xbc   : > { %1746 = vmatpush.bf16.msrb.mxu2 %v3209_v57  ;;  %v3513_v57 = vor.u32 %v4204_v49, %v3512_v48  ;;  %v3133_v63 = vor.u32 %v4106_v55, %v3130_v56  ;;  %v4054_v55 = vld [vmem:[#allocation5 + $0x2c] sm:$0xf]  ;;  %v2922_v56 = vld [vmem:[#allocation5 + $0x38] sm:$0xf0] }
  0xbd   : > { %1759 = vmatpush.bf16.msrb.mxu3 %v3337_v61  ;;  %v4200_v61 = vld [vmem:[#allocation5 + $0x4b4] sm:$0xf0]  ;;  %v3386_v30 = vld [vmem:[#allocation5 + $0x3d8] sm:$0xf0]  ;;  %v4162_v54 = vld [vmem:[#allocation5 + $0x38c] sm:$0xf] }
  0xbe   : > { %1721 = vmatpush.bf16.msrb.mxu0 %v2937_v3  ;;  %v4102_v3 = vld [vmem:[#allocation5 + $0x1ac] sm:$0xf] }
  0xbf   : > { %1734 = vmatpush.bf16.msrb.mxu1 %v3065_v4  ;;  %v3114_v4 = vld [vmem:[#allocation5 + $0x1b8] sm:$0xf0] }
  0xc0   : > { %1747 = vmatpush.bf16.msrb.mxu2 %v3193_v5  ;;  %v3497_v5 = vor.u32 %v4200_v61, %v3496_v60  ;;  %v3117_v11 = vor.u32 %v4102_v3, %v3114_v4  ;;  %v3416_v60 = vld [vmem:[#allocation5 + $0x408] sm:$0xf]  ;;  %v4180_v61 = vld [vmem:[#allocation5 + $0x414] sm:$0xf0]  ;;  %v2906_v4 = vld [vmem:[#allocation5 + $0x18] sm:$0xf0] }
  0xc1   : > { %1760 = vmatpush.bf16.msrb.mxu3 %v3321_v9  ;;  %v4196_v9 = vld [vmem:[#allocation5 + $0x494] sm:$0xf0] }
  0xc2   : > { %1722 = vmatpush.bf16.msrb.mxu0 %v2921_v15  ;;  %v4098_v15 = vld [vmem:[#allocation5 + $0x18c] sm:$0xf]  ;;  %v3481_v17 = vor.u32 %v4196_v9, %v3480_v8  ;;  %v3274_v8 = vld [vmem:[#allocation5 + $0x2f8] sm:$0xf0] }
  0xc3   : > { %1735 = vmatpush.bf16.msrb.mxu1 %v3049_v21  ;;  %v3609_v21 = vor.u32 %v4228_v12, %v3608_v10  ;;  %v4174_v9 = vld [vmem:[#allocation5 + $0x3ec] sm:$0xf]  ;;  %v3417_v10 = vor.u32 %v4180_v61, %v3416_v60 }
  0xc4   : > { %1748 = vmatpush.bf16.msrb.mxu2 %v3177_v23  ;;  %v2973_v23 = vor.u32 %v4066_v13, %v2970_v14  ;;  %v4206_v12 = vld [vmem:[#allocation5 + $0x4ec] sm:$0xf]  ;;  %v3530_v13 = vld [vmem:[#allocation5 + $0x4f8] sm:$0xf0]  ;;  %v3545_v14 = vor.u32 %v4212_v1, %v3544_v0 }
  0xc5   : > { %1761 = vmatpush.bf16.msrb.mxu3 %v3305_v27  ;;  %v3101_v27 = vor.u32 %v4098_v15, %v3098_v16  ;;  %v2909_v15 = vor.u32 %v4050_v2, %v2906_v4  ;;  %v4238_v16 = vld [vmem:[#allocation5 + $0x5ec] sm:$0xf]  ;;  %v3533_v25 = vor.u32 %v4206_v12, %v3530_v13  ;;  %v3338_v2 = vld [vmem:[#allocation5 + $0x378] sm:$0xf0] }
  0xc6   : > { %1723 = vmatpush.bf16.msrb.mxu0 %v2905_v34  ;;  %v3593_v34 = vor.u32 %v4224_v28, %v3592_v26  ;;  %v4138_v26 = vld [vmem:[#allocation5 + $0x2cc] sm:$0xf]  ;;  %v3466_v4 = vld [vmem:[#allocation5 + $0x478] sm:$0xf0] }
  0xc7   : > { %1736 = vmatpush.bf16.msrb.mxu1 %v3033_v40  ;;  %v3576_v40 = vld [vmem:[#allocation5 + $0x548] sm:$0xf]  ;;  %v4170_v28 = vld [vmem:[#allocation5 + $0x3cc] sm:$0xf] }
  0xc8   : > { %1749 = vmatpush.bf16.msrb.mxu2 %v3161_v41  ;;  %v3085_v41 = vor.u32 %v4094_v31, %v3082_v32  ;;  %v3577_v48 = vor.u32 %v4220_v42, %v3576_v40  ;;  %v4202_v31 = vld [vmem:[#allocation5 + $0x4cc] sm:$0xf]  ;;  %v3514_v32 = vld [vmem:[#allocation5 + $0x4d8] sm:$0xf0] }
  0xc9   : > { %1762 = vmatpush.bf16.msrb.mxu3 %v3289_v44  ;;  %1724 = vmatmul.bf16.vlgmr.msrb.gmra.mxu0 %v4898_v19  ;;  %v2938_v44 = vld [vmem:[#allocation5 + $0x58] sm:$0xf0]  ;;  %v4134_v40 = vld [vmem:[#allocation5 + $0x2ac] sm:$0xf] }
  0xca   : > { %1768 = vmatpush.bf16.msra.mxu0 %v3529_v45  ;;  %1737 = vmatmul.bf16.vlgmr.msrb.gmra.mxu1 %v4902_v22  ;;  %v4090_v45 = vld [vmem:[#allocation5 + $0x14c] sm:$0xf]  ;;  %v2941_v49 = vor.u32 %v4058_v43, %v2938_v44  ;;  %v3370_v44 = vld [vmem:[#allocation5 + $0x3b8] sm:$0xf0] }
  0xcb   : > { %1781 = vmatpush.bf16.msra.mxu1 %v3657_v46  ;;  %1750 = vmatmul.bf16.vlgmr.msrb.gmra.mxu2 %v4896_v18  ;;  %v3066_v46 = vld [vmem:[#allocation5 + $0x158] sm:$0xf0]  ;;  %v4166_v42 = vld [vmem:[#allocation5 + $0x3ac] sm:$0xf] }
  0xcc   : > { %1794 = vmatpush.bf16.msra.mxu2 %v3021_v47  ;;  %1763 = vmatmul.bf16.vlgmr.msrb.gmra.mxu3 %v4900_v20  ;;  %v3449_v47 = vor.u32 %v4188_v39, %v3448_v37  ;;  %v3069_v53 = vor.u32 %v4090_v45, %v3066_v46  ;;  %v3389_v37 = vor.u32 %v4170_v28, %v3386_v30  ;;  %v4198_v45 = vld [vmem:[#allocation5 + $0x4ac] sm:$0xf]  ;;  %v3498_v46 = vld [vmem:[#allocation5 + $0x4b8] sm:$0xf0] }
  0xcd   : > { %1807 = vmatpush.bf16.msra.mxu3 %v3149_v51  ;;  %v4184_v51 = vld [vmem:[#allocation5 + $0x434] sm:$0xf0]  ;;  %v3517_v39 = vor.u32 %v4202_v31, %v3514_v32  ;;  %v4158_v0 = vld [vmem:[#allocation5 + $0x36c] sm:$0xf]  ;;  %v3178_v28 = vld [vmem:[#allocation5 + $0x238] sm:$0xf0] }
  0xce   : > { %1769 = vmatpush.bf16.msra.mxu0 %v3513_v57  ;;  %v4086_v57 = vld [vmem:[#allocation5 + $0x12c] sm:$0xf]  ;;  %v3306_v32 = vld [vmem:[#allocation5 + $0x338] sm:$0xf0] }
  0xcf   : > { %1782 = vmatpush.bf16.msra.mxu1 %v3641_v58  ;;  %v3050_v58 = vld [vmem:[#allocation5 + $0x138] sm:$0xf0]  ;;  %v4154_v12 = vld [vmem:[#allocation5 + $0x34c] sm:$0xf] }
  0xd0   : > { %1795 = vmatpush.bf16.msra.mxu2 %v3005_v59  ;;  %v3433_v59 = vor.u32 %v4184_v51, %v3432_v50  ;;  %v3053_v3 = vor.u32 %v4086_v57, %v3050_v58  ;;  %v3373_v50 = vor.u32 %v4166_v42, %v3370_v44  ;;  %v3501_v51 = vor.u32 %v4198_v45, %v3498_v46  ;;  %v4194_v57 = vld [vmem:[#allocation5 + $0x48c] sm:$0xf]  ;;  %v3482_v58 = vld [vmem:[#allocation5 + $0x498] sm:$0xf0] }
  0xd1   : > { %1808 = vmatpush.bf16.msra.mxu3 %v3133_v63  ;;  %v2925_v63 = vor.u32 %v4054_v55, %v2922_v56  ;;  %v3354_v56 = vld [vmem:[#allocation5 + $0x398] sm:$0xf0]  ;;  %v4146_v44 = vld [vmem:[#allocation5 + $0x30c] sm:$0xf] }
  0xd2   : > { %1770 = vmatpush.bf16.msra.mxu0 %v3497_v5  ;;  %v4082_v5 = vld [vmem:[#allocation5 + $0x10c] sm:$0xf]  ;;  %v3357_v61 = vor.u32 %v4162_v54, %v3354_v56  ;;  %v3290_v45 = vld [vmem:[#allocation5 + $0x318] sm:$0xf0]  ;;  %v4263_v54 = vld [vmem:[#allocation8 + $0xb0] sm:$0xf0] }
  0xd3   : > { %1783 = vmatpush.bf16.msra.mxu1 %v3625_v6  ;;  %v3034_v6 = vld [vmem:[#allocation5 + $0x118] sm:$0xf0]  ;;  %v3844_v56 = vld [vmem:[#allocation8 + $0x168] sm:$0xf] }
  0xd4   : > { %1796 = vmatpush.bf16.msra.mxu2 %v2989_v7  ;;  %v4142_v7 = vld [vmem:[#allocation5 + $0x2ec] sm:$0xf] }
  0xd5   : > { %1809 = vmatpush.bf16.msra.mxu3 %v3117_v11  ;;  %v3402_v11 = vld [vmem:[#allocation5 + $0x3f8] sm:$0xf0] }
  0xd6   : > { %1771 = vmatpush.bf16.msra.mxu0 %v3481_v17  ;;  %v3658_v17 = vld [vmem:[#allocation5 + $0x5f8] sm:$0xf0]  ;;  %v3405_v24 = vor.u32 %v4174_v9, %v3402_v11 }
  0xd7   : > { %1784 = vmatpush.bf16.msra.mxu1 %v3609_v21  ;;  %v3037_v21 = vor.u32 %v4082_v5, %v3034_v6  ;;  %v3661_v29 = vor.u32 %v4238_v16, %v3658_v17  ;;  %v4222_v5 = vld [vmem:[#allocation5 + $0x56c] sm:$0xf]  ;;  %v3594_v6 = vld [vmem:[#allocation5 + $0x578] sm:$0xf0] }
  0xd8   : > { %1797 = vmatpush.bf16.msra.mxu2 %v2973_v23  ;;  %v3277_v23 = vor.u32 %v4142_v7, %v3274_v8  ;;  %v3341_v8 = vor.u32 %v4158_v0, %v3338_v2  ;;  %v3194_v11 = vld [vmem:[#allocation5 + $0x258] sm:$0xf0]  ;;  %v3597_v13 = vor.u32 %v4222_v5, %v3594_v6  ;;  %v4218_v17 = vld [vmem:[#allocation5 + $0x54c] sm:$0xf]  ;;  %v4260_v2 = vld [vmem:[#allocation8 + $0x98] sm:$0xf0] }
  0xd9   : > { %1810 = vmatpush.bf16.msra.mxu3 %v3101_v27  ;;  %v3258_v27 = vld [vmem:[#allocation5 + $0x2d8] sm:$0xf0] }
  0xda   : > { %1772 = vmatpush.bf16.msra.mxu0 %v3465_v33  ;;  %v4234_v33 = vld [vmem:[#allocation5 + $0x5cc] sm:$0xf]  ;;  %v3450_v16 = vld [vmem:[#allocation5 + $0x458] sm:$0xf0] }
  0xdb   : > { %1785 = vmatpush.bf16.msra.mxu1 %v3593_v34  ;;  %v3642_v34 = vld [vmem:[#allocation5 + $0x5d8] sm:$0xf0] }
  0xdc   : > { %1798 = vmatpush.bf16.msra.mxu2 %v2957_v36  ;;  %v3261_v36 = vor.u32 %v4138_v26, %v3258_v27  ;;  %v3645_v43 = vor.u32 %v4234_v33, %v3642_v34  ;;  %v4118_v27 = vld [vmem:[#allocation5 + $0x22c] sm:$0xf]  ;;  %v3434_v34 = vld [vmem:[#allocation5 + $0x438] sm:$0xf0] }
  0xdd   : > { %1811 = vmatpush.bf16.msra.mxu3 %v3085_v41  ;;  %v3242_v41 = vld [vmem:[#allocation5 + $0x2b8] sm:$0xf0]  ;;  %v4182_v33 = vld [vmem:[#allocation5 + $0x42c] sm:$0xf] }
  0xde   : > { %1773 = vmatpush.bf16.msra.mxu0 %v3449_v47  ;;  %v4230_v47 = vld [vmem:[#allocation5 + $0x5ac] sm:$0xf]  ;;  %v3437_v42 = vor.u32 %v4182_v33, %v3434_v34  ;;  %v3688_v33 = vld [vmem:[#allocation8 + $0x30] sm:$0xf]  ;;  %v4248_v34 = vld [vmem:[#allocation8 + $0x38] sm:$0xf0] }
  0xdf   : > { %1786 = vmatpush.bf16.msra.mxu1 %v3577_v48  ;;  %v3626_v48 = vld [vmem:[#allocation5 + $0x5b8] sm:$0xf0] }
  0xe0   : > { %1799 = vmatpush.bf16.msra.mxu2 %v2941_v49  ;;  %v3245_v49 = vor.u32 %v4134_v40, %v3242_v41  ;;  %v3629_v55 = vor.u32 %v4230_v47, %v3626_v48  ;;  %v4114_v40 = vld [vmem:[#allocation5 + $0x20c] sm:$0xf] }
  0xe1   : > { %1812 = vmatpush.bf16.msra.mxu3 %v3069_v53  ;;  %v3226_v53 = vld [vmem:[#allocation5 + $0x298] sm:$0xf0]  ;;  %v4178_v48 = vld [vmem:[#allocation5 + $0x40c] sm:$0xf] }
  0xe2   : > { %1774 = vmatpush.bf16.msra.mxu0 %v3433_v59  ;;  %v4226_v59 = vld [vmem:[#allocation5 + $0x58c] sm:$0xf]  ;;  %v3229_v60 = vor.u32 %v4130_v52, %v3226_v53  ;;  %v3546_v52 = vld [vmem:[#allocation5 + $0x518] sm:$0xf0] }
  0xe3   : > { %1787 = vmatpush.bf16.msra.mxu1 %v3561_v62  ;;  %v4126_v62 = vld [vmem:[#allocation5 + $0x26c] sm:$0xf] }
  0xe4   : > { %1800 = vmatpush.bf16.msra.mxu2 %v2925_v63  ;;  %v3210_v63 = vld [vmem:[#allocation5 + $0x278] sm:$0xf0]  ;;  %v3748_v53 = vld [vmem:[#allocation8 + $0xa8] sm:$0xf] }
  0xe5   : > { %1813 = vmatpush.bf16.msra.mxu3 %v3053_v3  ;;  %v4190_v3 = vld [vmem:[#allocation5 + $0x46c] sm:$0xf]  ;;  %v3213_v7 = vor.u32 %v4126_v62, %v3210_v63  ;;  %v3749_v62 = vor.u32 %v4263_v54, %v3748_v53  ;;  %v3928_v54 = vld [vmem:[#allocation8 + $0x210] sm:$0xf] }
  0xe6   : > { %1775 = vmatpush.bf16.msra.mxu0 %v3417_v10  ;;  %v3469_v9 = vor.u32 %v4190_v3, %v3466_v4  ;;  %v4122_v10 = vld [vmem:[#allocation5 + $0x24c] sm:$0xf]  ;;  %v3832_v3 = vld [vmem:[#allocation8 + $0x150] sm:$0xf]  ;;  %v4284_v4 = vld [vmem:[#allocation8 + $0x158] sm:$0xf0] }
  0xe7   : > { %1788 = vmatpush.bf16.msra.mxu1 %v3545_v14  ;;  %v3322_v14 = vld [vmem:[#allocation5 + $0x358] sm:$0xf0] }
  0xe8   : > { %1801 = vmatpush.bf16.msra.mxu2 %v2909_v15  ;;  %v4186_v15 = vld [vmem:[#allocation5 + $0x44c] sm:$0xf] }
  0xe9   : > { %1814 = vmatpush.bf16.msra.mxu3 %v3037_v21  ;;  %1776 = vmatmul.bf16.vlgmr.msra.gmra.mxu0 %v4909_v35  ;;  %v3578_v21 = vld [vmem:[#allocation5 + $0x558] sm:$0xf0]  ;;  %v3453_v26 = vor.u32 %v4186_v15, %v3450_v16 }
  0xea   : > { %1820 = vmatpush.bf16.msrb.mxu0 %v3277_v23  ;;  %1789 = vmatmul.bf16.vlgmr.msra.gmra.mxu1 %v4911_v38  ;;  %v3197_v23 = vor.u32 %v4122_v10, %v3194_v11  ;;  %v3581_v31 = vor.u32 %v4218_v17, %v3578_v21  ;;  %v3724_v10 = vld [vmem:[#allocation8 + $0x78] sm:$0xf]  ;;  %v4257_v11 = vld [vmem:[#allocation8 + $0x80] sm:$0xf0]  ;;  %v4254_v17 = vld [vmem:[#allocation8 + $0x68] sm:$0xf0] }
  0xeb   : > { %1833 = vmatpush.bf16.msrb.mxu1 %v3405_v24  ;;  %1802 = vmatmul.bf16.vlgmr.msra.gmra.mxu2 %v4898_v19  ;;  %v3610_v19 = vld [vmem:[#allocation5 + $0x598] sm:$0xf0]  ;;  %v3808_v21 = vld [vmem:[#allocation8 + $0x120] sm:$0xf] }
  0xec   : > { %1846 = vmatpush.bf16.msrb.mxu2 %v3533_v25  ;;  %1815 = vmatmul.bf16.vlgmr.msra.gmra.mxu3 %v4902_v22  ;;  %v3485_v22 = vor.u32 %v4194_v57, %v3482_v58  ;;  %v3613_v1 = vor.u32 %v4226_v59, %v3610_v19  ;;  %v3325_v25 = vor.u32 %v4154_v12, %v3322_v14  ;;  %v4287_v57 = vld [vmem:[#allocation8 + $0x170] sm:$0xf0]  ;;  %v4935_v58 = vld [vmem:[#allocation7] sm:$0xf]  ;;  %v3820_v12 = vld [vmem:[#allocation8 + $0x138] sm:$0xf] }
  0xed   : > { %1859 = vmatpush.bf16.msrb.mxu3 %v3661_v29  ;;  %v4150_v29 = vld [vmem:[#allocation5 + $0x32c] sm:$0xf]  ;;  %v3293_v19 = vor.u32 %v4146_v44, %v3290_v45  ;;  %v3845_v63 = vor.u32 %v4287_v57, %v3844_v56  ;;  %v571_v0 = vperm.slane %v4935_v58, 0  ;;  %v3725_v14 = vor.u32 %v4257_v11, %v3724_v10  ;;  %v4311_v45 = vld [vmem:[#allocation8 + $0x230] sm:$0xf0] }
  0xee   : > { %1821 = vmatpush.bf16.msrb.mxu0 %v3261_v36  ;;  %v4214_v36 = vld [vmem:[#allocation5 + $0x52c] sm:$0xf]  ;;  %v3309_v41 = vor.u32 %v4150_v29, %v3306_v32  ;;  %v4275_v29 = vld [vmem:[#allocation8 + $0x110] sm:$0xf0] }
  0xef   : > { %1834 = vmatpush.bf16.msrb.mxu1 %v3389_v37  ;;  %v3562_v37 = vld [vmem:[#allocation5 + $0x538] sm:$0xf0]  ;;  %v3940_v44 = vld [vmem:[#allocation8 + $0x228] sm:$0xf] }
  0xf0   : > { %1847 = vmatpush.bf16.msrb.mxu2 %v3517_v39  ;;  %v4929_v24 = vpop.f32.mrf.mxu0  ;;  %v3181_v39 = vor.u32 %v4118_v27, %v3178_v28  ;;  %v3565_v47 = vor.u32 %v4214_v36, %v3562_v37  ;;  %v3700_v27 = vld [vmem:[#allocation8 + $0x48] sm:$0xf]  ;;  %v4251_v28 = vld [vmem:[#allocation8 + $0x50] sm:$0xf0]  ;;  %v3784_v36 = vld [vmem:[#allocation8 + $0xf0] sm:$0xf] }
  0xf1   : > { %1860 = vmatpush.bf16.msrb.mxu3 %v3645_v43  ;;  %v3162_v43 = vld [vmem:[#allocation5 + $0x218] sm:$0xf0]  ;;  %v4272_v37 = vld [vmem:[#allocation8 + $0xf8] sm:$0xf0] }
  0xf2   : > { %1822 = vmatpush.bf16.msrb.mxu0 %v3245_v49  ;;  %v4931_v30 = vpop.f32.mrf.mxu1  ;;  %v3418_v49 = vld [vmem:[#allocation5 + $0x418] sm:$0xf0] }
  0xf3   : > { %1835 = vmatpush.bf16.msrb.mxu1 %v3373_v50  ;;  %v4210_v50 = vld [vmem:[#allocation5 + $0x50c] sm:$0xf] }
  0xf4   : > { %1848 = vmatpush.bf16.msrb.mxu2 %v3501_v51 }
  0xf5   : > { %1861 = vmatpush.bf16.msrb.mxu3 %v3629_v55  ;;  %v1595_v46 = vpop.f32.mrf.mxu2  ;;  %v3165_v55 = vor.u32 %v4114_v40, %v3162_v43 }
  0xf6   : > { %1823 = vmatpush.bf16.msrb.mxu0 %v3229_v60  ;;  %v3421_v60 = vor.u32 %v4178_v48, %v3418_v49  ;;  %v3676_v48 = vld [vmem:[#allocation8 + $0x18] sm:$0xf]  ;;  %v4245_v49 = vld [vmem:[#allocation8 + $0x20] sm:$0xf0] }
  0xf7   : > { %1836 = vmatpush.bf16.msrb.mxu1 %v3357_v61  ;;  %v4933_v51 = vpop.f32.mrf.mxu3  ;;  %v3677_v53 = vor.u32 %v4245_v49, %v3676_v48  ;;  %v3702_v48 = vld [vmem:[#allocation8 + $0x54] sm:$0xf0]  ;;  %v4274_v49 = vld [vmem:[#allocation8 + $0x10c] sm:$0xf] }
  0xf8   : > { %1849 = vmatpush.bf16.msrb.mxu2 %v3485_v22  ;;  %v1571_v59 = vpop.f32.mrf.mxu0  ;;  %v3549_v22 = vor.u32 %v4210_v50, %v3546_v52  ;;  %v3941_v50 = vor.u32 %v4311_v45, %v3940_v44  ;;  %v4269_v52 = vld [vmem:[#allocation8 + $0xe0] sm:$0xf0] }
  0xf9   : > { %1862 = vmatpush.bf16.msrb.mxu3 %v3613_v1  ;;  %v3736_v1 = vld [vmem:[#allocation8 + $0x90] sm:$0xf]  ;;  %v3664_v59 = vld [vmem:[#allocation8] sm:$0xf] }
  0xfa   : > { %1824 = vmatpush.bf16.msrb.mxu0 %v3213_v7  ;;  %v1584_v61 = vpop.f32.mrf.mxu1  ;;  %v3737_v6 = vor.u32 %v4260_v2, %v3736_v1  ;;  %v4286_v1 = vld [vmem:[#allocation8 + $0x16c] sm:$0xf]  ;;  %v3846_v2 = vld [vmem:[#allocation8 + $0x174] sm:$0xf0] }
  0xfb   : > { %1837 = vmatpush.bf16.msrb.mxu1 %v3341_v8  ;;  %v1570_v8 = vadd.f32 %v4929_v24, %v571_v0  ;;  %v3849_v11 = vor.u32 %v4286_v1, %v3846_v2 }
  0xfc   : > { %1850 = vmatpush.bf16.msrb.mxu2 %v3469_v9  ;;  %v3833_v9 = vor.u32 %v4284_v4, %v3832_v3 }
  0xfd   : > { %1863 = vmatpush.bf16.msrb.mxu3 %v3597_v13  ;;  %v1597_v5 = vpop.f32.mrf.mxu2  ;;  %v4281_v13 = vld [vmem:[#allocation8 + $0x140] sm:$0xf0]  ;;  %v1583_v15 = vadd.f32 %v4931_v30, %v1570_v8 }
  0xfe   : > { %1825 = vmatpush.bf16.msrb.mxu0 %v3197_v23  ;;  %v3821_v16 = vor.u32 %v4281_v13, %v3820_v12  ;;  %v4278_v23 = vld [vmem:[#allocation8 + $0x128] sm:$0xf0]  ;;  %v3916_v5 = vld [vmem:[#allocation8 + $0x1f8] sm:$0xf]  ;;  %v4259_v12 = vld [vmem:[#allocation8 + $0x94] sm:$0xf] }
  0xff   : > { %1838 = vmatpush.bf16.msrb.mxu1 %v3325_v25  ;;  %v1610_v7 = vpop.f32.mrf.mxu3  ;;  %v3738_v13 = vld [vmem:[#allocation8 + $0x9c] sm:$0xf0] }
 0x100   : > { %1851 = vmatpush.bf16.msrb.mxu2 %v3453_v26  ;;  %v1596_v26 = vadd.f32 %v1595_v46, %v1583_v15  ;;  %v4283_v15 = vld [vmem:[#allocation8 + $0x154] sm:$0xf] }
 0x101   : > { %1864 = vmatpush.bf16.msrb.mxu3 %v3581_v31  ;;  %v3701_v31 = vor.u32 %v4251_v28, %v3700_v27  ;;  %v3822_v28 = vld [vmem:[#allocation8 + $0x144] sm:$0xf0] }
 0x102   : > { %1826 = vmatpush.bf16.msrb.mxu0 %v3181_v39  ;;  %v1609_v30 = vadd.f32 %v4933_v51, %v1596_v26  ;;  %v3772_v51 = vld [vmem:[#allocation8 + $0xd8] sm:$0xf]  ;;  %v3726_v26 = vld [vmem:[#allocation8 + $0x84] sm:$0xf0] }
 0x103   : > { %1839 = vmatpush.bf16.msrb.mxu1 %v3309_v41  ;;  %v3773_v57 = vor.u32 %v4269_v52, %v3772_v51  ;;  %v3798_v52 = vld [vmem:[#allocation8 + $0x114] sm:$0xf0] }
 0x104   : > { %1852 = vmatpush.bf16.msrb.mxu2 %v3437_v42  ;;  %v3689_v42 = vor.u32 %v4248_v34, %v3688_v33  ;;  %v4253_v33 = vld [vmem:[#allocation8 + $0x64] sm:$0xf]  ;;  %v3714_v34 = vld [vmem:[#allocation8 + $0x6c] sm:$0xf0] }
 0x105   : > { %1865 = vmatpush.bf16.msrb.mxu3 %v3565_v47  ;;  %v3785_v47 = vor.u32 %v4272_v37, %v3784_v36  ;;  %v4277_v36 = vld [vmem:[#allocation8 + $0x124] sm:$0xf]  ;;  %v3717_v44 = vor.u32 %v4253_v33, %v3714_v34  ;;  %v4288_v33 = vld [vmem:[#allocation8 + $0x178] sm:$0xf0] }
 0x106   : > { %1827 = vmatpush.bf16.msrb.mxu0 %v3165_v55  ;;  %v1621_v24 = vpop.f32.mrf.mxu0  ;;  %v4308_v55 = vld [vmem:[#allocation8 + $0x218] sm:$0xf0] }
 0x107   : > { %1840 = vmatpush.bf16.msrb.mxu1 %v3293_v19  ;;  %v1622_v46 = vadd.f32 %v1621_v24, %v1609_v30  ;;  %v4242_v19 = vld [vmem:[#allocation8 + $0x8] sm:$0xf0]  ;;  %v3929_v61 = vor.u32 %v4308_v55, %v3928_v54  ;;  %v4293_v54 = vld [vmem:[#allocation8 + $0x1a0] sm:$0xf0] }
 0x108   : > { %1853 = vmatpush.bf16.msrb.mxu2 %v3421_v60  ;;  %v3760_v60 = vld [vmem:[#allocation8 + $0xc0] sm:$0xf]  ;;  %v3665_v4 = vor.u32 %v4242_v19, %v3664_v59  ;;  %v4247_v59 = vld [vmem:[#allocation8 + $0x34] sm:$0xf] }
 0x109   : > { %1866 = vmatpush.bf16.msrb.mxu3 %v3549_v22  ;;  %1828 = vmatmul.bf16.vlgmr.msrb.gmra.mxu0 %v4896_v18  ;;  %v3712_v18 = vld [vmem:[#allocation8 + $0x60] sm:$0xf]  ;;  %v4266_v22 = vld [vmem:[#allocation8 + $0xc8] sm:$0xf0] }
 0x10a   : > { %2528 = vmatpush.bf16.msra.mxu0 %v3749_v62  ;;  %1841 = vmatmul.bf16.vlgmr.msrb.gmra.mxu1 %v4900_v20  ;;  %v3713_v25 = vor.u32 %v4254_v17, %v3712_v18  ;;  %v1634_v20 = vpop.f32.mrf.mxu1  ;;  %v4262_v62 = vld [vmem:[#allocation8 + $0xac] sm:$0xf]  ;;  %v3761_v8 = vor.u32 %v4266_v22, %v3760_v60  ;;  %v3904_v18 = vld [vmem:[#allocation8 + $0x1e0] sm:$0xf]  ;;  %v4271_v60 = vld [vmem:[#allocation8 + $0xf4] sm:$0xf] }
 0x10b   : > { %2541 = vmatpush.bf16.msra.mxu1 %v3845_v63  ;;  %1854 = vmatmul.bf16.vlgmr.msrb.gmra.mxu2 %v4909_v35  ;;  %v3809_v35 = vor.u32 %v4278_v23, %v3808_v21  ;;  %v1635_v56 = vadd.f32 %v1634_v20, %v1622_v46  ;;  %v3750_v63 = vld [vmem:[#allocation8 + $0xb4] sm:$0xf0]  ;;  %v4302_v17 = vld [vmem:[#allocation8 + $0x1e8] sm:$0xf0]  ;;  %v3741_v23 = vor.u32 %v4259_v12, %v3738_v13  ;;  %v4256_v20 = vld [vmem:[#allocation8 + $0x7c] sm:$0xf] }
 0x10c   : > { %1867 = vmatmul.bf16.vlgmr.msrb.gmra.mxu3 %v4911_v38  ;;  %v3796_v38 = vld [vmem:[#allocation8 + $0x108] sm:$0xf]  ;;  %2554 = vmatpush.bf16.msra.mxu2 %v3941_v50  ;;  %v3905_v24 = vor.u32 %v4302_v17, %v3904_v18  ;;  %v3729_v30 = vor.u32 %v4256_v20, %v3726_v26  ;;  %v3690_v19 = vld [vmem:[#allocation8 + $0x3c] sm:$0xf0]  ;;  %v4268_v12 = vld [vmem:[#allocation8 + $0xdc] sm:$0xf] }
 0x10d   : > { %v3797_v32 = vor.u32 %v4275_v29, %v3796_v38  ;;  %v1872_v7 = vmax.f32 %v1635_v56, 0.0  ;;  %v3892_v38 = vld [vmem:[#allocation8 + $0x1c8] sm:$0xf]  ;;  %v4299_v29 = vld [vmem:[#allocation8 + $0x1d0] sm:$0xf0] }
 0x10e   : > { %2529 = vmatpush.bf16.msra.mxu0 %v3737_v6  ;;  %v4945_v39 = vpop.f32.mrf.mxu2  ;;  %v1623_v41 = vpop.f32.mrf.mxu0  ;;  %v4305_v6 = vld [vmem:[#allocation8 + $0x200] sm:$0xf0]  ;;  %v3786_v22 = vld [vmem:[#allocation8 + $0xfc] sm:$0xf0]  ;;  %v3774_v13 = vld [vmem:[#allocation8 + $0xe4] sm:$0xf0] }
 0x10f   : > { %2542 = vmatpush.bf16.msra.mxu1 %v3833_v9  ;;  %v4947_v40 = vpop.f32.mrf.mxu3  ;;  %v3753_v9 = vor.u32 %v4262_v62, %v3750_v63  ;;  %v3917_v10 = vor.u32 %v4305_v6, %v3916_v5  ;;  %v4950_v21 = vpack.c.bf16 %v1872_v7, %v1872_v7  ;;  %v3810_v41 = vld [vmem:[#allocation8 + $0x12c] sm:$0xf0]  ;;  %v3856_v62 = vld [vmem:[#allocation8 + $0x180] sm:$0xf]  ;;  %v4290_v63 = vld [vmem:[#allocation8 + $0x188] sm:$0xf0]  ;;  %v3789_v7 = vor.u32 %v4271_v60, %v3786_v22 }
 0x110   : > { %2555 = vmatpush.bf16.msra.mxu2 %v3929_v61  ;;  %v3813_v45 = vor.u32 %v4277_v36, %v3810_v41  ;;  %v3857_v2 = vor.u32 %v4290_v63, %v3856_v62  ;;  %v3942_v5 = vld [vmem:[#allocation8 + $0x234] sm:$0xf0]  ;;  %v3666_v17 = vld [vmem:[#allocation8 + $0xc] sm:$0xf0]  ;;  %v3777_v20 = vor.u32 %v4268_v12, %v3774_v13  ;;  %v4265_v26 = vld [vmem:[#allocation8 + $0xc4] sm:$0xf] }
 0x111   : > { %v4304_v41 = vld [vmem:[#allocation8 + $0x1fc] sm:$0xf]  ;;  %v3828_v22 = vld [vmem:[#allocation8 + $0x140] sm:$0xf]  ;;  %v3894_v63 = vld [vmem:[#allocation8 + $0x1d4] sm:$0xf0] }
 0x112   : > { %2530 = vmatpush.bf16.msra.mxu0 %v3725_v14  ;;  %v1636_v43 = vpop.f32.mrf.mxu1  ;;  %v572_v14 = vperm.slane %v4935_v58, 1  ;;  %v3882_v12 = vld [vmem:[#allocation8 + $0x1bc] sm:$0xf0] }
 0x113   : > { %2543 = vmatpush.bf16.msra.mxu1 %v3821_v16  ;;  %v3834_v16 = vld [vmem:[#allocation8 + $0x15c] sm:$0xf0] }
 0x114   : > { %2556 = vmatpush.bf16.msra.mxu2 %v3917_v10  ;;  %v1648_v27 = vadd.f32 %v4945_v39, %v572_v14  ;;  %v4296_v39 = vld [vmem:[#allocation8 + $0x1b8] sm:$0xf0] }
 0x116   : > { %2531 = vmatpush.bf16.msra.mxu0 %v3713_v25  ;;  %v1649_v0 = vpop.f32.mrf.mxu2  ;;  %v3837_v25 = vor.u32 %v4283_v15, %v3834_v16  ;;  %v1661_v37 = vadd.f32 %v4947_v40, %v1648_v27  ;;  %v4241_v16 = vld [vmem:[#allocation8 + $0x4] sm:$0xf]  ;;  %v3756_v27 = vld [vmem:[#allocation8 + $0xb0] sm:$0xf] }
 0x117   : > { %2544 = vmatpush.bf16.msra.mxu1 %v3809_v35  ;;  %v1662_v3 = vpop.f32.mrf.mxu3  ;;  %v4280_v35 = vld [vmem:[#allocation8 + $0x13c] sm:$0xf] }
 0x118   : > { %2557 = vmatpush.bf16.msra.mxu2 %v3905_v24  ;;  %v3693_v3 = vor.u32 %v4247_v59, %v3690_v19  ;;  %v3930_v24 = vld [vmem:[#allocation8 + $0x21c] sm:$0xf0]  ;;  %v4329_v59 = vld [vmem:[#allocation8 + $0x2c0] sm:$0xf0]  ;;  %v4298_v19 = vld [vmem:[#allocation8 + $0x1cc] sm:$0xf] }
 0x11a   : > { %2532 = vmatpush.bf16.msra.mxu0 %v3701_v31  ;;  %v3893_v31 = vor.u32 %v4299_v29, %v3892_v38  ;;  %v4264_v38 = vld [vmem:[#allocation8 + $0xb8] sm:$0xf0] }
 0x11b   : > { %2545 = vmatpush.bf16.msra.mxu1 %v3797_v32  ;;  %v3825_v32 = vor.u32 %v4280_v35, %v3822_v28  ;;  %v3762_v35 = vld [vmem:[#allocation8 + $0xcc] sm:$0xf0] }
 0x11c   : > { %2558 = vmatpush.bf16.msra.mxu2 %v3893_v31  ;;  %v4036_v31 = vld [vmem:[#allocation8 + $0x2e8] sm:$0xf] }
 0x11e   : > { %2533 = vmatpush.bf16.msra.mxu0 %v3689_v42  ;;  %v3880_v42 = vld [vmem:[#allocation8 + $0x1b0] sm:$0xf] }
 0x11f   : > { %2546 = vmatpush.bf16.msra.mxu1 %v3785_v47  ;;  %v3881_v43 = vor.u32 %v4296_v39, %v3880_v42  ;;  %v4250_v47 = vld [vmem:[#allocation8 + $0x4c] sm:$0xf]  ;;  %v3918_v42 = vld [vmem:[#allocation8 + $0x204] sm:$0xf0]  ;;  %v3765_v39 = vor.u32 %v4265_v26, %v3762_v35  ;;  %v4276_v26 = vld [vmem:[#allocation8 + $0x118] sm:$0xf0] }
 0x120   : > { %v3705_v56 = vor.u32 %v4250_v47, %v3702_v48  ;;  %v4261_v47 = vld [vmem:[#allocation8 + $0xa0] sm:$0xf0]  ;;  %v4024_v48 = vld [vmem:[#allocation8 + $0x2d0] sm:$0xf] }
 0x121   : > { %2559 = vmatpush.bf16.msra.mxu2 %v3881_v43  ;;  %v3757_v43 = vor.u32 %v4264_v38, %v3756_v27  ;;  %v3870_v38 = vld [vmem:[#allocation8 + $0x1a4] sm:$0xf0] }
 0x122   : > { %2534 = vmatpush.bf16.msra.mxu0 %v3677_v53  ;;  %v3868_v53 = vld [vmem:[#allocation8 + $0x198] sm:$0xf] }
 0x123   : > { %2547 = vmatpush.bf16.msra.mxu1 %v3773_v57  ;;  %v3869_v40 = vor.u32 %v4293_v54, %v3868_v53  ;;  %v3801_v57 = vor.u32 %v4274_v49, %v3798_v52  ;;  %v4332_v49 = vld [vmem:[#allocation8 + $0x2d8] sm:$0xf0]  ;;  %v3732_v53 = vld [vmem:[#allocation8 + $0x80] sm:$0xf]  ;;  %v4301_v54 = vld [vmem:[#allocation8 + $0x1e4] sm:$0xf] }
 0x124   : > { %v4025_v52 = vor.u32 %v4332_v49, %v4024_v48  ;;  %v4246_v49 = vld [vmem:[#allocation8 + $0x28] sm:$0xf0] }
 0x125   : > { %2560 = vmatpush.bf16.msra.mxu2 %v3869_v40  ;;  %v3906_v40 = vld [vmem:[#allocation8 + $0x1ec] sm:$0xf0] }
 0x126   : > { %2535 = vmatpush.bf16.msra.mxu0 %v3665_v4  ;;  %v1673_v46 = vpop.f32.mrf.mxu0  ;;  %v4310_v4 = vld [vmem:[#allocation8 + $0x22c] sm:$0xf] }
 0x127   : > { %2548 = vmatpush.bf16.msra.mxu1 %v3761_v8  ;;  %v1674_v50 = vadd.f32 %v1673_v46, %v1661_v37  ;;  %v1686_v51 = vpop.f32.mrf.mxu1  ;;  %v4244_v8 = vld [vmem:[#allocation8 + $0x1c] sm:$0xf]  ;;  %v3669_v37 = vor.u32 %v4241_v16, %v3666_v17 }
 0x129   : > { %2536 = vmatmul.bf16.vlgmr.msra.gmra.mxu0 %v4950_v21  ;;  %v1687_v55 = vadd.f32 %v1686_v51, %v1674_v50  ;;  %2561 = vmatpush.bf16.msra.mxu2 %v3857_v2  ;;  %v3840_v50 = vld [vmem:[#allocation8 + $0x158] sm:$0xf]  ;;  %v4285_v51 = vld [vmem:[#allocation8 + $0x160] sm:$0xf0]  ;;  %v4000_v2 = vld [vmem:[#allocation8 + $0x2a0] sm:$0xf] }
 0x12a   : > { %2580 = vmatpush.bf16.msrb.mxu0 %v3753_v9  ;;  %v3678_v9 = vld [vmem:[#allocation8 + $0x24] sm:$0xf0]  ;;  %v3841_v60 = vor.u32 %v4285_v51, %v3840_v50 }
 0x12b   : > { %2593 = vmatpush.bf16.msrb.mxu1 %v3849_v11  ;;  %v3945_v11 = vor.u32 %v4310_v4, %v3942_v5  ;;  %v3681_v18 = vor.u32 %v4244_v8, %v3678_v9  ;;  %v3816_v9 = vld [vmem:[#allocation8 + $0x128] sm:$0xf] }
 0x12d   : > { %2606 = vmatpush.bf16.msrb.mxu2 %v3945_v11  ;;  %v4295_v11 = vld [vmem:[#allocation8 + $0x1b4] sm:$0xf] }
 0x12e   : > { %2581 = vmatpush.bf16.msrb.mxu0 %v3741_v23  ;;  %v1699_v61 = vpop.f32.mrf.mxu2  ;;  %v1675_v10 = vpop.f32.mrf.mxu0  ;;  %v4307_v23 = vld [vmem:[#allocation8 + $0x214] sm:$0xf] }
 0x12f   : > { %2594 = vmatpush.bf16.msrb.mxu1 %v3837_v25  ;;  %v1700_v0 = vadd.f32 %v1699_v61, %v1687_v55  ;;  %v1712_v1 = vpop.f32.mrf.mxu3  ;;  %v1688_v14 = vpop.f32.mrf.mxu1  ;;  %v3933_v28 = vor.u32 %v4307_v23, %v3930_v24  ;;  %v4258_v61 = vld [vmem:[#allocation8 + $0x88] sm:$0xf0]  ;;  %v4279_v10 = vld [vmem:[#allocation8 + $0x130] sm:$0xf0]  ;;  %v3988_v23 = vld [vmem:[#allocation8 + $0x288] sm:$0xf] }
 0x130   : > { %v3733_v4 = vor.u32 %v4258_v61, %v3732_v53  ;;  %v3708_v14 = vld [vmem:[#allocation8 + $0x50] sm:$0xf]  ;;  %v3817_v16 = vor.u32 %v4279_v10, %v3816_v9  ;;  %v4323_v24 = vld [vmem:[#allocation8 + $0x290] sm:$0xf0]  ;;  %v4317_v53 = vld [vmem:[#allocation8 + $0x260] sm:$0xf0] }
 0x131   : > { %v1713_v6 = vadd.f32 %v1712_v1, %v1700_v0  ;;  %2607 = vmatpush.bf16.msrb.mxu2 %v3933_v28  ;;  %v4282_v0 = vld [vmem:[#allocation8 + $0x148] sm:$0xf0]  ;;  %v3897_v1 = vor.u32 %v4298_v19, %v3894_v63  ;;  %v3989_v27 = vor.u32 %v4323_v24, %v3988_v23  ;;  %v4292_v28 = vld [vmem:[#allocation8 + $0x19c] sm:$0xf]  ;;  %v3672_v19 = vld [vmem:[#allocation8 + $0x8] sm:$0xf] }
 0x132   : > { %2582 = vmatpush.bf16.msrb.mxu0 %v3729_v30  ;;  %v4335_v30 = vld [vmem:[#allocation8 + $0x2f0] sm:$0xf0]  ;;  %v3829_v5 = vor.u32 %v4282_v0, %v3828_v22  ;;  %v3952_v22 = vld [vmem:[#allocation8 + $0x240] sm:$0xf]  ;;  %v4334_v63 = vld [vmem:[#allocation8 + $0x2ec] sm:$0xf] }
 0x133   : > { %2595 = vmatpush.bf16.msrb.mxu1 %v3825_v32  ;;  %v1873_v15 = vmax.f32 %v1713_v6, 0.0  ;;  %v3852_v32 = vld [vmem:[#allocation8 + $0x170] sm:$0xf]  ;;  %v4037_v36 = vor.u32 %v4335_v30, %v4036_v31  ;;  %v3720_v6 = vld [vmem:[#allocation8 + $0x68] sm:$0xf]  ;;  %v3873_v30 = vor.u32 %v4292_v28, %v3870_v38 }
 0x134   : > { %v3853_v46 = vor.u32 %v4288_v33, %v3852_v32  ;;  %v3696_v31 = vld [vmem:[#allocation8 + $0x38] sm:$0xf]  ;;  %v4249_v33 = vld [vmem:[#allocation8 + $0x40] sm:$0xf0]  ;;  %v3768_v0 = vld [vmem:[#allocation8 + $0xc8] sm:$0xf] }
 0x135   : > { %v4955_v25 = vpack.c.bf16 %v1873_v15, %v1873_v15  ;;  %2567 = vmatpush.bf16.msra.mxu3 %v4037_v36  ;;  %v3885_v15 = vor.u32 %v4295_v11, %v3882_v12  ;;  %v4320_v36 = vld [vmem:[#allocation8 + $0x278] sm:$0xf0]  ;;  %v4331_v10 = vld [vmem:[#allocation8 + $0x2d4] sm:$0xf]  ;;  %v4026_v11 = vld [vmem:[#allocation8 + $0x2dc] sm:$0xf0] }
 0x136   : > { %2583 = vmatpush.bf16.msrb.mxu0 %v3717_v44  ;;  %v1701_v29 = vpop.f32.mrf.mxu2  ;;  %v3744_v44 = vld [vmem:[#allocation8 + $0x98] sm:$0xf]  ;;  %v4029_v12 = vor.u32 %v4331_v10, %v4026_v11  ;;  %v4002_v23 = vld [vmem:[#allocation8 + $0x2ac] sm:$0xf0]  ;;  %v3864_v10 = vld [vmem:[#allocation8 + $0x188] sm:$0xf] }
 0x137   : > { %2596 = vmatpush.bf16.msrb.mxu1 %v3813_v45  ;;  %v1714_v34 = vpop.f32.mrf.mxu3  ;;  %v3921_v45 = vor.u32 %v4304_v41, %v3918_v42  ;;  %v3745_v55 = vor.u32 %v4261_v47, %v3744_v44  ;;  %v4273_v41 = vld [vmem:[#allocation8 + $0x100] sm:$0xf0]  ;;  %v3697_v44 = vor.u32 %v4249_v33, %v3696_v31  ;;  %v3948_v31 = vld [vmem:[#allocation8 + $0x230] sm:$0xf]  ;;  %v3978_v33 = vld [vmem:[#allocation8 + $0x27c] sm:$0xf0] }
 0x138   : > { %2549 = vmatmul.bf16.vlgmr.msra.gmra.mxu1 %v4955_v25  ;;  %v3976_v34 = vld [vmem:[#allocation8 + $0x270] sm:$0xf]  ;;  %v4291_v11 = vld [vmem:[#allocation8 + $0x190] sm:$0xf0] }
 0x139   : > { %2608 = vmatpush.bf16.msrb.mxu2 %v3921_v45  ;;  %2568 = vmatpush.bf16.msra.mxu3 %v4025_v52  ;;  %v3977_v42 = vor.u32 %v4320_v36, %v3976_v34  ;;  %v3684_v45 = vld [vmem:[#allocation8 + $0x20] sm:$0xf]  ;;  %v3964_v52 = vld [vmem:[#allocation8 + $0x258] sm:$0xf] }
 0x13a   : > { %2584 = vmatpush.bf16.msrb.mxu0 %v3705_v56  ;;  %v3909_v56 = vor.u32 %v4301_v54, %v3906_v40  ;;  %v3780_v54 = vld [vmem:[#allocation8 + $0xe0] sm:$0xf]  ;;  %v4270_v40 = vld [vmem:[#allocation8 + $0xe8] sm:$0xf0] }
 0x13b   : > { %2597 = vmatpush.bf16.msrb.mxu1 %v3801_v57  ;;  %v4012_v57 = vld [vmem:[#allocation8 + $0x2b8] sm:$0xf]  ;;  %v3781_v61 = vor.u32 %v4270_v40, %v3780_v54 }
 0x13c   : > { %v4013_v62 = vor.u32 %v4329_v59, %v4012_v57  ;;  %v573_v57 = vperm.slane %v4935_v58, 2  ;;  %v3685_v59 = vor.u32 %v4246_v49, %v3684_v45 }
 0x13d   : > { %2609 = vmatpush.bf16.msrb.mxu2 %v3909_v56  ;;  %v3965_v56 = vor.u32 %v4317_v53, %v3964_v52  ;;  %v4313_v52 = vld [vmem:[#allocation8 + $0x244] sm:$0xf]  ;;  %v3954_v53 = vld [vmem:[#allocation8 + $0x24c] sm:$0xf0] }
 0x13e   : > { %2585 = vmatpush.bf16.msrb.mxu0 %v3693_v3  ;;  %v4326_v3 = vld [vmem:[#allocation8 + $0x2a8] sm:$0xf0]  ;;  %2569 = vmatpush.bf16.msra.mxu3 %v4013_v62  ;;  %v3957_v54 = vor.u32 %v4313_v52, %v3954_v53 }
 0x13f   : > { %2598 = vmatpush.bf16.msrb.mxu1 %v3789_v7  ;;  %v4255_v7 = vld [vmem:[#allocation8 + $0x70] sm:$0xf0]  ;;  %v4001_v8 = vor.u32 %v4326_v3, %v4000_v2  ;;  %v4314_v62 = vld [vmem:[#allocation8 + $0x248] sm:$0xf0]  ;;  %v4038_v3 = vld [vmem:[#allocation8 + $0x2f4] sm:$0xf0] }
 0x140   : > { %v3721_v13 = vor.u32 %v4255_v7, %v3720_v6  ;;  %v3953_v2 = vor.u32 %v4314_v62, %v3952_v22  ;;  %v574_v22 = vperm.slane %v4935_v58, 3  ;;  %v3865_v58 = vor.u32 %v4291_v11, %v3864_v10  ;;  %v2008_v52 = vld [vmem:[%s5009_s4] sm:$0x7] }
 0x141   : > { %2610 = vmatpush.bf16.msrb.mxu2 %v3897_v1  ;;  %v4267_v1 = vld [vmem:[#allocation8 + $0xd0] sm:$0xf0]  ;;  %v2010_v53 = vperm.slane %v2008_v52, 0 }
 0x142   : > { %2586 = vmatpush.bf16.msrb.mxu0 %v3681_v18  ;;  %v4252_v18 = vld [vmem:[#allocation8 + $0x58] sm:$0xf0]  ;;  %2570 = vmatpush.bf16.msra.mxu3 %v4001_v8  ;;  %v3769_v8 = vor.u32 %v4267_v1, %v3768_v0  ;;  %v4297_v0 = vld [vmem:[#allocation8 + $0x1c0] sm:$0xf0] }
 0x143   : > { %2599 = vmatpush.bf16.msrb.mxu1 %v3777_v20  ;;  %v3804_v20 = vld [vmem:[#allocation8 + $0x110] sm:$0xf]  ;;  %v3709_v29 = vor.u32 %v4252_v18, %v3708_v14  ;;  %v4328_v14 = vld [vmem:[#allocation8 + $0x2bc] sm:$0xf] }
 0x144   : > { %v3805_v32 = vor.u32 %v4276_v26, %v3804_v20  ;;  %v4322_v26 = vld [vmem:[#allocation8 + $0x28c] sm:$0xf] }
 0x145   : > { %2611 = vmatpush.bf16.msrb.mxu2 %v3885_v15  ;;  %v4014_v15 = vld [vmem:[#allocation8 + $0x2c4] sm:$0xf0] }
 0x146   : > { %2587 = vmatpush.bf16.msrb.mxu0 %v3669_v37  ;;  %v1725_v17 = vpop.f32.mrf.mxu0  ;;  %2571 = vmatpush.bf16.msra.mxu3 %v3989_v27  ;;  %v3792_v37 = vld [vmem:[#allocation8 + $0xf8] sm:$0xf] }
 0x147   : > { %2600 = vmatpush.bf16.msrb.mxu1 %v3765_v39  ;;  %v4960_v35 = vpop.f32.mrf.mxu1  ;;  %v4289_v39 = vld [vmem:[#allocation8 + $0x184] sm:$0xf]  ;;  %v3793_v48 = vor.u32 %v4273_v41, %v3792_v37  ;;  %v3990_v27 = vld [vmem:[#allocation8 + $0x294] sm:$0xf0] }
 0x148   : > { %v3993_v28 = vor.u32 %v4322_v26, %v3990_v27  ;;  %v3936_v37 = vld [vmem:[#allocation8 + $0x218] sm:$0xf] }
 0x149   : > { %2588 = vmatmul.bf16.vlgmr.msrb.gmra.mxu0 %v4950_v21  ;;  %2612 = vmatpush.bf16.msrb.mxu2 %v3873_v30 }
 0x14a   : > { %2632 = vmatpush.bf16.msra.mxu0 %v3757_v43  ;;  %2601 = vmatmul.bf16.vlgmr.msrb.gmra.mxu1 %v4955_v25  ;;  %v3858_v43 = vld [vmem:[#allocation8 + $0x18c] sm:$0xf0] }
 0x14b   : > { %2645 = vmatpush.bf16.msra.mxu1 %v3853_v46  ;;  %v3861_v47 = vor.u32 %v4289_v39, %v3858_v43  ;;  %2572 = vmatpush.bf16.msra.mxu3 %v3977_v42  ;;  %v4309_v39 = vld [vmem:[#allocation8 + $0x220] sm:$0xf0]  ;;  %v4316_v43 = vld [vmem:[#allocation8 + $0x25c] sm:$0xf] }
 0x14c   : > { %v3937_v49 = vor.u32 %v4309_v39, %v3936_v37  ;;  %v4324_v37 = vld [vmem:[#allocation8 + $0x298] sm:$0xf0]  ;;  %v3984_v39 = vld [vmem:[#allocation8 + $0x278] sm:$0xf] }
 0x14d   : > { %2613 = vmatpush.bf16.msrb.mxu2 %v3861_v47 }
 0x14e   : > { %2633 = vmatpush.bf16.msra.mxu0 %v3745_v55  ;;  %v1751_v46 = vpop.f32.mrf.mxu2  ;;  %v1727_v50 = vpop.f32.mrf.mxu0 }
 0x14f   : > { %2646 = vmatpush.bf16.msra.mxu1 %v3841_v60  ;;  %v1764_v51 = vpop.f32.mrf.mxu3  ;;  %v1740_v55 = vpop.f32.mrf.mxu1  ;;  %v4243_v60 = vld [vmem:[#allocation8 + $0x10] sm:$0xf0]  ;;  %2573 = vmatpush.bf16.msra.mxu3 %v3965_v56  ;;  %v3924_v50 = vld [vmem:[#allocation8 + $0x200] sm:$0xf]  ;;  %v3912_v56 = vld [vmem:[#allocation8 + $0x1e8] sm:$0xf] }
 0x150   : > { %v3673_v6 = vor.u32 %v4243_v60, %v3672_v19  ;;  %v3900_v60 = vld [vmem:[#allocation8 + $0x1d0] sm:$0xf] }
 0x152   : > { %2634 = vmatpush.bf16.msra.mxu0 %v3733_v4  ;;  %v4041_v4 = vor.u32 %v4334_v63, %v4038_v3  ;;  %v3888_v63 = vld [vmem:[#allocation8 + $0x1b8] sm:$0xf]  ;;  %v3876_v3 = vld [vmem:[#allocation8 + $0x1a0] sm:$0xf] }
 0x153   : > { %2647 = vmatpush.bf16.msra.mxu1 %v3829_v5  ;;  %v1726_v5 = vadd.f32 %v1725_v17, %v573_v57  ;;  %2574 = vmatpush.bf16.msra.mxu3 %v3953_v2  ;;  %v4325_v17 = vld [vmem:[#allocation8 + $0x2a4] sm:$0xf]  ;;  %v4303_v57 = vld [vmem:[#allocation8 + $0x1f0] sm:$0xf0]  ;;  %v3889_v2 = vor.u32 %v4297_v0, %v3888_v63  ;;  %v2012_v63 = vperm.slane %v2008_v52, 2 }
 0x154   : > { %v4005_v24 = vor.u32 %v4325_v17, %v4002_v23  ;;  %v3913_v19 = vor.u32 %v4303_v57, %v3912_v56  ;;  %v4044_v23 = vld [vmem:[#allocation8 + $0x2f0] sm:$0xf] }
 0x156   : > { %2635 = vmatpush.bf16.msra.mxu0 %v3721_v13  ;;  %v1753_v7 = vpop.f32.mrf.mxu2  ;;  %v1739_v13 = vadd.f32 %v4960_v35, %v1726_v5 }
 0x157   : > { %2648 = vmatpush.bf16.msra.mxu1 %v3817_v16  ;;  %v1766_v9 = vpop.f32.mrf.mxu3  ;;  %2619 = vmatpush.bf16.msrb.mxu3 %v4041_v4  ;;  %v4017_v16 = vor.u32 %v4328_v14, %v4014_v15  ;;  %v4294_v4 = vld [vmem:[#allocation8 + $0x1a8] sm:$0xf0] }
 0x158   : > { %v1752_v18 = vadd.f32 %v1751_v46, %v1739_v13 }
 0x15a   : > { %2636 = vmatpush.bf16.msra.mxu0 %v3709_v29  ;;  %v1765_v20 = vadd.f32 %v1764_v51, %v1752_v18  ;;  %v4306_v51 = vld [vmem:[#allocation8 + $0x208] sm:$0xf0] }
 0x15b   : > { %2649 = vmatpush.bf16.msra.mxu1 %v3805_v32  ;;  %2620 = vmatpush.bf16.msrb.mxu3 %v4029_v12  ;;  %v4312_v32 = vld [vmem:[#allocation8 + $0x238] sm:$0xf0]  ;;  %v3925_v40 = vor.u32 %v4306_v51, %v3924_v50  ;;  %v4315_v50 = vld [vmem:[#allocation8 + $0x250] sm:$0xf0] }
 0x15c   : > { %v3949_v36 = vor.u32 %v4312_v32, %v3948_v31  ;;  %v4330_v32 = vld [vmem:[#allocation8 + $0x2c8] sm:$0xf0] }
 0x15e   : > { %2637 = vmatpush.bf16.msra.mxu0 %v3697_v44  ;;  %v3966_v44 = vld [vmem:[#allocation8 + $0x264] sm:$0xf0] }
 0x15f   : > { %2650 = vmatpush.bf16.msra.mxu1 %v3793_v48  ;;  %2621 = vmatpush.bf16.msrb.mxu3 %v4017_v16  ;;  %v3969_v47 = vor.u32 %v4316_v43, %v3966_v44  ;;  %v4321_v43 = vld [vmem:[#allocation8 + $0x280] sm:$0xf0] }
 0x160   : > { %v3985_v44 = vor.u32 %v4321_v43, %v3984_v39 }
 0x162   : > { %2638 = vmatpush.bf16.msra.mxu0 %v3685_v59 }
 0x163   : > { %2651 = vmatpush.bf16.msra.mxu1 %v3781_v61  ;;  %2622 = vmatpush.bf16.msrb.mxu3 %v4005_v24  ;;  %v4300_v61 = vld [vmem:[#allocation8 + $0x1d8] sm:$0xf0] }
 0x164   : > { %v3901_v62 = vor.u32 %v4300_v61, %v3900_v60  ;;  %v4336_v24 = vld [vmem:[#allocation8 + $0x2f8] sm:$0xf0] }
 0x165   : > { %v4045_v26 = vor.u32 %v4336_v24, %v4044_v23 }
 0x166   : > { %2639 = vmatpush.bf16.msra.mxu0 %v3673_v6  ;;  %v1777_v35 = vpop.f32.mrf.mxu0 }
 0x167   : > { %2652 = vmatpush.bf16.msra.mxu1 %v3769_v8  ;;  %v1778_v38 = vadd.f32 %v1777_v35, %v1765_v20  ;;  %v1790_v29 = vpop.f32.mrf.mxu1  ;;  %2623 = vmatpush.bf16.msrb.mxu3 %v3993_v28  ;;  %v3877_v8 = vor.u32 %v4294_v4, %v3876_v3  ;;  %v4032_v35 = vld [vmem:[#allocation8 + $0x2d8] sm:$0xf]  ;;  %v4333_v28 = vld [vmem:[#allocation8 + $0x2e0] sm:$0xf0] }
 0x168   : > { %v4033_v31 = vor.u32 %v4333_v28, %v4032_v35 }
 0x169   : > { %2640 = vmatmul.bf16.vlgmr.msra.gmra.mxu0 %v4950_v21  ;;  %v1791_v30 = vadd.f32 %v1790_v29, %v1778_v38  ;;  %v4319_v21 = vld [vmem:[#allocation8 + $0x274] sm:$0xf] }
 0x16a   : > { %2653 = vmatmul.bf16.vlgmr.msra.gmra.mxu1 %v4955_v25  ;;  %v3981_v25 = vor.u32 %v4319_v21, %v3978_v33  ;;  %v4008_v33 = vld [vmem:[#allocation8 + $0x2a8] sm:$0xf] }
 0x16b   : > { %v1874_v34 = vmax.f32 %v1791_v30, 0.0  ;;  %v4020_v30 = vld [vmem:[#allocation8 + $0x2c0] sm:$0xf] }
 0x16c   : > { %2624 = vmatpush.bf16.msrb.mxu3 %v3981_v25  ;;  %v4021_v21 = vor.u32 %v4330_v32, %v4020_v30  ;;  %v4327_v25 = vld [vmem:[#allocation8 + $0x2b0] sm:$0xf0] }
 0x16d   : > { %v1878_v41 = vpack.c.bf16 %v1874_v34, %v1874_v34  ;;  %v4009_v34 = vor.u32 %v4327_v25, %v4008_v33 }
 0x16e   : > { %v1803_v42 = vpop.f32.mrf.mxu2  ;;  %v1779_v46 = vpop.f32.mrf.mxu0 }
 0x16f   : > { %v1816_v45 = vpop.f32.mrf.mxu3  ;;  %2562 = vmatmul.bf16.vlgmr.msra.gmra.mxu2 %v1878_v41  ;;  %v1792_v48 = vpop.f32.mrf.mxu1  ;;  %v1804_v1 = vadd.f32 %v1803_v42, %v574_v22  ;;  %v4318_v46 = vld [vmem:[#allocation8 + $0x268] sm:$0xf0] }
 0x170   : > { %2658 = vmatpush.bf16.msra.mxu2 %v3949_v36  ;;  %2625 = vmatpush.bf16.msrb.mxu3 %v3969_v47  ;;  %v3996_v36 = vld [vmem:[#allocation8 + $0x290] sm:$0xf] }
 0x171   : > { %v1817_v5 = vadd.f32 %v1816_v45, %v1804_v1  ;;  %v3972_v45 = vld [vmem:[#allocation8 + $0x260] sm:$0xf] }
 0x172   : > { %v3973_v47 = vor.u32 %v4318_v46, %v3972_v45 }
 0x174   : > { %2659 = vmatpush.bf16.msra.mxu2 %v3937_v49  ;;  %2626 = vmatpush.bf16.msrb.mxu3 %v3957_v54  ;;  %v3960_v49 = vld [vmem:[#allocation8 + $0x248] sm:$0xf] }
 0x175   : > { %v3961_v51 = vor.u32 %v4315_v50, %v3960_v49  ;;  %v2730_v49 = vld [vmem:[#allocation11] sm:$0x7] }
 0x176   : > { %v1805_v55 = vpop.f32.mrf.mxu2 }
 0x177   : > { %v1818_v59 = vpop.f32.mrf.mxu3 }
 0x178   : > { %2660 = vmatpush.bf16.msra.mxu2 %v3925_v40  ;;  %v2011_v59 = vperm.slane %v2008_v52, 1 }
 0x17c   : > { %2661 = vmatpush.bf16.msra.mxu2 %v3913_v19 }
 0x17f   : > { %2614 = vmatmul.bf16.vlgmr.msrb.gmra.mxu2 %v1878_v41 }
 0x180   : > { %2662 = vmatpush.bf16.msra.mxu2 %v3901_v62 }
 0x184   : > { %2663 = vmatpush.bf16.msra.mxu2 %v3889_v2 }
 0x186   : > { %v1829_v6 = vpop.f32.mrf.mxu0 }
 0x187   : > { %v1842_v7 = vpop.f32.mrf.mxu1  ;;  %v1830_v9 = vadd.f32 %v1829_v6, %v1817_v5 }
 0x188   : > { %2664 = vmatpush.bf16.msra.mxu2 %v3877_v8 }
 0x189   : > { %v1843_v12 = vadd.f32 %v1842_v7, %v1830_v9 }
 0x18c   : > { %2665 = vmatpush.bf16.msra.mxu2 %v3865_v58 }
 0x18e   : > { %v1855_v13 = vpop.f32.mrf.mxu2  ;;  %v1831_v16 = vpop.f32.mrf.mxu0 }
 0x18f   : > { %v1856_v14 = vadd.f32 %v1855_v13, %v1843_v12  ;;  %v1868_v15 = vpop.f32.mrf.mxu3  ;;  %v1844_v18 = vpop.f32.mrf.mxu1  ;;  %2666 = vmatmul.bf16.vlgmr.msra.gmra.mxu2 %v1878_v41  ;;  %v3997_v41 = vor.u32 %v4324_v37, %v3996_v36 }
 0x191   : > { %v1869_v17 = vadd.f32 %v1868_v15, %v1856_v14 }
 0x193   : > { %v1875_v20 = vmax.f32 %v1869_v17, 0.0 }
 0x195   : > { %v1879_v27 = vpack.c.bf16 %v1875_v20, %v1875_v20 }
 0x196   : > { %v1857_v38 = vpop.f32.mrf.mxu2 }
 0x197   : > { %v1870_v29 = vpop.f32.mrf.mxu3  ;;  %2575 = vmatmul.bf16.vlgmr.msra.gmra.mxu3 %v1879_v27 }
 0x198   : > { %2671 = vmatpush.bf16.msra.mxu3 %v4045_v26 }
 0x19c   : > { %2672 = vmatpush.bf16.msra.mxu3 %v4033_v31 }
 0x1a0   : > { %2673 = vmatpush.bf16.msra.mxu3 %v4021_v21 }
 0x1a4   : > { %2674 = vmatpush.bf16.msra.mxu3 %v4009_v34 }
 0x1a6   : > { %v2537_v42 = vpop.f32.mrf.mxu0 }
 0x1a7   : > { %2627 = vmatmul.bf16.vlgmr.msrb.gmra.mxu3 %v1879_v27  ;;  %v2538_v54 = vadd.f32 %v2537_v42, %v2010_v53 }
 0x1a8   : > { %2675 = vmatpush.bf16.msra.mxu3 %v3997_v41 }
 0x1ac   : > { %2676 = vmatpush.bf16.msra.mxu3 %v3985_v44 }
 0x1ae   : > { %v2539_v48 = vpop.f32.mrf.mxu0 }
 0x1b0   : > { %2677 = vmatpush.bf16.msra.mxu3 %v3973_v47  ;;  %v2719_v47 = vld [vmem:[#allocation10] sm:$0x7] }
 0x1b1   : > { %v2721_v50 = vperm.slane %v2719_v47, 0 }
 0x1b4   : > { %2678 = vmatpush.bf16.msra.mxu3 %v3961_v51  ;;  %v2722_v51 = vperm.slane %v2719_v47, 1 }
 0x1b5   : > { %v2550_v40 = vpop.f32.mrf.mxu1 }
 0x1b6   : > { %v2551_v55 = vadd.f32 %v2550_v40, %v2538_v54 }
 0x1b7   : > { %2679 = vmatmul.bf16.vlgmr.msra.gmra.mxu3 %v1879_v27 }
 0x1bd   : > { %v2552_v57 = vpop.f32.mrf.mxu1 }
 0x1be   : > { %v2732_v57 = vperm.slane %v2730_v49, 0 }
 0x1c6   : > { %v2589_v56 = vpop.f32.mrf.mxu0 }
 0x1c7   : > { %v2590_v19 = vadd.f32 %v2589_v56, %v2011_v59  ;;  %v2602_v61 = vpop.f32.mrf.mxu1  ;;  %v2733_v59 = vperm.slane %v2730_v49, 1 }
 0x1c9   : > { %v2603_v22 = vadd.f32 %v2602_v61, %v2590_v19 }
 0x1ce   : > { %v2591_v60 = vpop.f32.mrf.mxu0 }
 0x1cf   : > { %v2604_v62 = vpop.f32.mrf.mxu1 }
 0x1e6   : > { %v2641_v0 = vpop.f32.mrf.mxu0 }
 0x1e7   : > { %v2642_v1 = vadd.f32 %v2641_v0, %v2012_v63  ;;  %v2654_v2 = vpop.f32.mrf.mxu1 }
 0x1e9   : > { %v2655_v3 = vadd.f32 %v2654_v2, %v2642_v1 }
 0x1ee   : > { %v2643_v4 = vpop.f32.mrf.mxu0 }
 0x1ef   : > { %v2656_v5 = vpop.f32.mrf.mxu1 }
 0x1f2   : > { %v2563_v6 = vpop.f32.mrf.mxu2 }
 0x1f3   : > { %v2564_v7 = vadd.f32 %v2563_v6, %v2551_v55  ;;  %v2723_v55 = vperm.slane %v2719_v47, 2 }
 0x1fa   : > { %v2565_v8 = vpop.f32.mrf.mxu2 }
 0x202   : > { %v2615_v9 = vpop.f32.mrf.mxu2 }
 0x203   : > { %v2616_v16 = vadd.f32 %v2615_v9, %v2603_v22  ;;  %v2734_v22 = vperm.slane %v2730_v49, 2 }
 0x20a   : > { %v2617_v10 = vpop.f32.mrf.mxu2 }
 0x212   : > { %v2667_v11 = vpop.f32.mrf.mxu2 }
 0x213   : > { %v2668_v23 = vadd.f32 %v2667_v11, %v2655_v3 }
 0x21a   : > { %v2576_v58 = vpop.f32.mrf.mxu3  ;;  %v2669_v12 = vpop.f32.mrf.mxu2 }
 0x21b   : > { %v2577_v17 = vadd.f32 %v2576_v58, %v2564_v7 }
 0x21d   : > { %v2684_v26 = vmax.f32 %v2577_v17, 0.0 }
 0x21f   : > { %v2692_v30 = vmul.f32 %v2684_v26, %v2684_v26 }
 0x222   : > { %v2578_v13 = vpop.f32.mrf.mxu3 }
 0x22a   : > { %v2628_v14 = vpop.f32.mrf.mxu3 }
 0x22b   : > { %v2629_v18 = vadd.f32 %v2628_v14, %v2616_v16 }
 0x22d   : > { %v2685_v24 = vmax.f32 %v2629_v18, 0.0 }
 0x22f   : > { %v2687_v28 = vadd.f32 %v2685_v24, %v2684_v26  ;;  %v2693_v29 = vmul.f32 %v2685_v24, %v2685_v24 }
 0x231   : > { %v2695_v21 = vadd.f32 %v2693_v29, %v2692_v30 }
 0x232   : > { %v2630_v15 = vpop.f32.mrf.mxu3 }
 0x23a   : > { %v2680_v20 = vpop.f32.mrf.mxu3 }
 0x23b   : > { %v2681_v27 = vadd.f32 %v2680_v20, %v2668_v23 }
 0x23d   : > { %v2686_v35 = vmax.f32 %v2681_v27, 0.0 }
 0x23f   : > { %v2688_v38 = vadd.f32 %v2687_v28, %v2686_v35  ;;  %v2694_v32 = vmul.f32 %v2686_v35, %v2686_v35 }
 0x241   : > { %2689 = vadd.xlane.f32.xlu0 %v2688_v38  ;;  %v2696_v33 = vadd.f32 %v2695_v21, %v2694_v32 }
 0x242   : > { %v2682_v31 = vpop.f32.mrf.mxu3 }
 0x249   : > { %2697 = vadd.xlane.f32.xlu0 %v2696_v33 }
 0x2b4   : > { %v2690_v25 = vpop.xlane.xlu0 %2689 }
 0x2b5   : > { %v2691_v34 = vmul.f32 0.0033333334, %v2690_v25 }
 0x2b7   : > { %v2700_v37 = vmul.f32 %v2691_v34, %v2691_v34  ;;  %v2702_v53 = vsub.f32 %v2684_v26, %v2691_v34  ;;  %v2703_v54 = vsub.f32 %v2685_v24, %v2691_v34  ;;  %v2704_v40 = vsub.f32 %v2686_v35, %v2691_v34 }
 0x2bc   : > { %v2698_v36 = vpop.xlane.xlu0 %2697 }
 0x2bd   : > { %v2699_v41 = vmul.f32 0.0033333334, %v2698_v36 }
 0x2bf   : > { %v2701_v42 = vsub.f32 %v2699_v41, %v2700_v37 }
 0x2c1   : > { %v2705_v39 = vadd.f32 1e-05, %v2701_v42 }
 0x2c3   : > { %4442 = vrsqrt.f32 %v2705_v39  ;;  %vm2712_vm1 = vweird.f32 %v2705_v39 }
 0x2c9   : > { %v4443_v43 = vpop.eup %4442 }
 0x2ca   : > { %v2707_v44 = vmul.f32 %v4443_v43, %v2705_v39  ;;  %vm2713_vm0 = vweird.f32 %v4443_v43 }
 0x2cb   : > { %vm2714_vm2 = vmor %vm2712_vm1, %vm2713_vm0 }
 0x2cc   : > { %v2708_v45 = vmul.f32 %v4443_v43, %v2707_v44 }
 0x2ce   : > { %v2709_v46 = vmul.f32 0.5, %v2708_v45 }
 0x2d0   : > { %v2710_v48 = vsub.f32 1.5, %v2709_v46 }
 0x2d2   : > { %v2711_v52 = vmul.f32 %v4443_v43, %v2710_v48 }
 0x2d4   : > { %v2715_v56 = vsel %vm2714_vm2, %v4443_v43, %v2711_v52 }
 0x2d5   : > { %v2716_v19 = vmul.f32 %v2715_v56, %v2702_v53  ;;  %v2717_v60 = vmul.f32 %v2715_v56, %v2703_v54  ;;  %v2718_v61 = vmul.f32 %v2715_v56, %v2704_v40 }
 0x2d7   : > { %v2727_v62 = vmul.f32 %v2721_v50, %v2716_v19  ;;  %v2728_v63 = vmul.f32 %v2722_v51, %v2717_v60  ;;  %v2729_v0 = vmul.f32 %v2723_v55, %v2718_v61 }
 0x2d9   : > { %v2738_v1 = vadd.f32 %v2732_v57, %v2727_v62  ;;  %v2739_v2 = vadd.f32 %v2733_v59, %v2728_v63  ;;  %v2740_v3 = vadd.f32 %v2734_v22, %v2729_v0 }
 0x2db   : > { %2741 = vst [vmem:[%s373_s17] sm:$0xff] %v2738_v1 }
 0x2dc   : > { %2742 = vst [vmem:[%s373_s17 + $0x8] sm:$0xff] %v2739_v2 }
 0x2dd   : > { %2743 = vst [vmem:[%s373_s17 + $0x10] sm:$0xff] %v2740_v3 }
 0x2de   : > { %4651 = shalt.err (!%p4648_p9)
}
 0x2df   : > { %4363 = dma.vmem_to_hbm [thread:$0]  (%p4839_p0), %s2759_s18, 384, %s2761_s19, %s2745_s20  }
 0x2e0 PF: > { %s2772_s12 = sand.u32 1, %s4690_s24   ;;  %p5027_p10 = scmp.ge.s32.totalorder %s4702_s27, 2 }
 0x2e1   : > { %s2773_s1 = scalar_lea.sflag [#allocation4], %s2772_s12 }
 0x2e2   : > { %p4386_p11 = pnand %p5027_p10, %p4845_p6 }
 0x2e4   : > { %p4387_p12 = pneg %p4386_p11 }
 0x2e6   : > { %4685 = dma.done.wait (%p4387_p12), %s2773_s1, 384  }
 0x2e7   : > { %4687 = vsyncadd (%p4387_p12), %s2773_s1, 4294966912  ;;  %p23_p2 = scmp.ge.s32.totalorder %s4819_s22, 4   ;;  %s5028_s24 = smov %s4694_s25 }
 0x2e8   : > { %s5029_s25 = smov %s4698_s26  ;;  %s5030_s26 = smov %s4831_s29 }
 0x2e9   : > { %s5031_s27 = smov %s4819_s22  ;;  %25 = sbr.rel (!%p23_p2) target bundleno = 13 (0xd), region = 113 }
 0x2ee   :  { %2779 = vsyncpa [#allocation3], 1 }
 0x2ef   :  { %2781 = vsyncpa [#allocation3 + $0x1], 1 }
 0x2f0   :  { %2782 = vsyncpa [#allocation6], 1 }
 0x2f1   :  { %2783 = vsyncpa [#allocation9], 1 }
 0x2f2   :  { %2784 = vsyncpa [#allocation12], 1 }
 0x2f3   :  { %2785 = vsyncpa [#allocation4], 1 }
 0x2f4   :  { %2787 = vsyncpa [#allocation4 + $0x1], 1 }

</bundles_post_ra>
